<compile_context>
chip_gen: v7x
topology: tpu7x:2x2x1
jax: 0.10.0
libtpu: 0.0.40
codegen_flags: <defaults>
</compile_context>

<pallas_src>
import functools

import jax
import jax.numpy as jnp
from jax.experimental import pallas as pl
from jax.experimental.pallas import tpu as pltpu

NUM_EXITS = 5
NUM_AUX = NUM_EXITS + 2        # e_1..e_5, gated CE, gated val_time


def _round_up(x, m):
    return (x + m - 1) // m * m


def _make_kernel(thr_neg, b_times):
    """Builds the Pallas kernel closure over the static scalar config."""

    def kernel(logits_ref, target_ref, b_ref, aux_ref):
        # logits_ref: [E, TN, C] (native dtype)   target_ref: [TN, 1] i32
        _, tn, c = logits_ref.shape
        tgt = target_ref[...]                                        # [TN,1]
        iota_c = jax.lax.broadcasted_iota(jnp.int32, (tn, c), 1)     # [TN,C]
        onehot = iota_c == tgt                                       # bool
        valid = (tgt != -100).astype(jnp.float32)                    # [TN,1]
        # Lane-reduction helper for the MXU (hoisted out of the exit loop).
        ones_mat = jnp.ones((c, 8), jnp.float32)

        def lane_sum(v):     # [TN,C] f32 -> [TN,1] f32, on the MXU
            return jnp.dot(v, ones_mat,
                           preferred_element_type=jnp.float32,
                           precision=jax.lax.Precision.HIGHEST)[:, 0:1]

        e_list, ce_list = [], []
        for i in range(NUM_EXITS):
            x_nat = logits_ref[i]                                    # [TN,C]
            # Row max on the native dtype is exact; cast only the column.
            m = jnp.max(x_nat, axis=1, keepdims=True).astype(jnp.float32)
            x = x_nat.astype(jnp.float32)                            # [TN,C]
            ex = jnp.exp(x - m)                                      # EUP
            denom = lane_sum(ex)                                     # MXU
            # max(softmax(x)) == exp(0)/denom == 1/denom (exact identity).
            e_i = -pl.reciprocal(denom, approx=False)                # [TN,1]
            # CE = m + log(denom) - x[target]  (0 for ignore_index samples).
            x_t = lane_sum(jnp.where(onehot, x, 0.0))                # MXU
            ce_i = (m + jnp.log(denom) - x_t) * valid                # [TN,1]
            e_list.append(e_i)
            ce_list.append(ce_i)

        # Heaviside step functions (see TODO above); kept boolean so the big
        # [TN,C] recombination below is a pure select.
        ha = lambda v: v > 0.0
        hb = lambda v: v >= 0.0
        hb1 = hb(e_list[0] - thr_neg[0])
        hb2 = hb(e_list[1] - thr_neg[1])
        hb3 = hb(e_list[2] - thr_neg[2])
        g_bool = [
            ha(thr_neg[0] - e_list[0]),
            ha(thr_neg[1] - e_list[1]) & hb1,
            ha(thr_neg[2] - e_list[2]) & hb1 & hb2,
            ha(thr_neg[3] - e_list[3]) & hb1 & hb2 & hb3,
            hb(e_list[3] - thr_neg[3]) & hb1 & hb2 & hb3,
        ]
        g = [gb.astype(jnp.float32) for gb in g_bool]                # [TN,1]

        vt = sum(b_times[i] * g[i] for i in range(NUM_EXITS))        # [TN,1]
        ce = sum(ce_list[i] * g[i] for i in range(NUM_EXITS))        # [TN,1]

        # Gated combination of the raw logits.  Gates are mutually exclusive
        # and exhaustive 0/1, so this is a nested select in the native dtype:
        # no full-tile f32 casts, no mul/add tree, no downcast.
        b = logits_ref[NUM_EXITS - 1]
        for i in range(NUM_EXITS - 2, -1, -1):
            b = jnp.where(g_bool[i], logits_ref[i], b)
        b_ref[...] = b

        # Pack per-sample columns [e_1..e_5, ce, vt] lane-wise -> one store.
        cols = e_list + [ce, vt]
        iota_a = jax.lax.broadcasted_iota(jnp.int32, (tn, NUM_AUX), 1)
        aux = jnp.zeros((tn, NUM_AUX), jnp.float32)
        for i, col in enumerate(cols):
            aux = jnp.where(iota_a == i, col, aux)
        aux_ref[...] = aux

    return kernel


def _choose_tile_and_vmem(n, c, in_dtype, block_n):
    """Derive the row tile and VMEM limit from C / dtype (v7x-safe budget)."""
    in_bytes = jnp.dtype(in_dtype).itemsize
    # Per-row VMEM bytes: double-buffered 5-exit input, double-buffered
    # outputs, plus ~6 f32/i32 [TN,C]-sized live temporaries in the body.
    per_row = (2 * NUM_EXITS * c * in_bytes
               + 2 * (c * in_bytes + NUM_AUX * 4)
               + 6 * c * 4)
    budget = 40 * 1024 * 1024            # fits v7x's 64 MiB physical VMEM
    tn_budget = max(16, (budget // per_row) // 16 * 16)
    # Keep >= 4 grid steps so the "parallel" axis feeds both v7x TensorCores
    # (and the DMA pipeline always has a next block).
    tn_multicore = _round_up(pl.cdiv(n, 4), 16)
    tn = max(16, min(int(block_n), tn_budget, tn_multicore, _round_up(n, 16)))
    vmem_limit = int(min(60 * 1024 * 1024,
                         max(32 * 1024 * 1024, per_row * tn + (1 << 20))))
    return tn, vmem_limit


@functools.partial(
    jax.jit,
    static_argnames=("thresholds", "b_times", "block_n", "buffer_count"))
def msd_val_loss(b_stacked, target, thresholds=(1.0,) * NUM_EXITS,
                 b_times=(0.0,) * NUM_EXITS, block_n=1024, buffer_count=2):
    """b_stacked: [5, N, C] logits (any float dtype), target: [N] int.

    Returns (b, CE, val_time, e_1, e_2, e_3, e_4, e_5) like the PyTorch
    MSD_val_loss_cpu.forward.
    """
    num_exits, n, c = b_stacked.shape
    assert num_exits == NUM_EXITS
    thr_neg = tuple(-1.0 * float(t) for t in thresholds)   # module negates
    bt = tuple(float(t) for t in b_times)

    tn, vmem_limit = _choose_tile_and_vmem(n, c, b_stacked.dtype, block_n)
    grid = (pl.cdiv(n, tn),)   # no wrapper-side padding: Pallas masks the
                               # ragged tail block on output writeback.

    tgt = target.astype(jnp.int32).reshape(n, 1)
    kernel = _make_kernel(thr_neg, bt)

    in_bytes = jnp.dtype(b_stacked.dtype).itemsize
    cost = pl.CostEstimate(
        flops=int(n) * int(c) * (NUM_EXITS * (4 + 2 * 2 * 8) + NUM_EXITS),
        transcendentals=NUM_EXITS * int(n) * int(c),
        bytes_accessed=(int(n) * int(c) * in_bytes * (NUM_EXITS + 1)
                        + int(n) * (4 + NUM_AUX * 4)),
    )

    logits_spec_kwargs = {}
    if buffer_count > 2:   # e.g. 3 on v5e where the HBM fetch has no slack
        logits_spec_kwargs["pipeline_mode"] = pl.Buffered(buffer_count)

    b_out, aux = pl.pallas_call(
        kernel,
        grid=grid,
        in_specs=[
            pl.BlockSpec((NUM_EXITS, tn, c), lambda i: (0, i, 0),
                         **logits_spec_kwargs),
            pl.BlockSpec((tn, 1), lambda i: (i, 0)),
        ],
        out_specs=(
            pl.BlockSpec((tn, c), lambda i: (i, 0)),
            pl.BlockSpec((tn, NUM_AUX), lambda i: (i, 0)),
        ),
        out_shape=(
            jax.ShapeDtypeStruct((n, c), b_stacked.dtype),       # b
            jax.ShapeDtypeStruct((n, NUM_AUX), jnp.float32),     # e_1..5,ce,vt
        ),
        compiler_params=pltpu.CompilerParams(
            dimension_semantics=("parallel",),
            vmem_limit_bytes=vmem_limit,
        ),
        cost_estimate=cost,
    )(b_stacked, tgt)

    e = tuple(aux[:, i] for i in range(NUM_EXITS))
    ce_mean = jnp.mean(aux[:, NUM_EXITS])      # torch.mean over all N samples
    vt_mean = jnp.mean(aux[:, NUM_EXITS + 1])
    return (b_out, ce_mean, vt_mean) + e


def _reference(b_stacked, target, thresholds, b_times):
    """Pure-JAX reference mirroring the PyTorch module (for verification)."""
    thr = [-1.0 * t for t in thresholds]
    x = b_stacked.astype(jnp.float32)
    sm = jax.nn.softmax(x, axis=-1)
    e = -jnp.max(sm, axis=-1)                                        # [E,N]
    ha = lambda v: (v > 0.0).astype(jnp.float32)
    hb = lambda v: (v >= 0.0).astype(jnp.float32)
    hb1, hb2, hb3 = hb(e[0] - thr[0]), hb(e[1] - thr[1]), hb(e[2] - thr[2])
    g = [ha(thr[0] - e[0]),
         ha(thr[1] - e[1]) * hb1,
         ha(thr[2] - e[2]) * hb1 * hb2,
         ha(thr[3] - e[3]) * hb1 * hb2 * hb3,
         hb(e[3] - thr[3]) * hb1 * hb2 * hb3]
    val_time = jnp.mean(sum(b_times[i] * g[i] for i in range(5)))
    logp = jax.nn.log_softmax(x, axis=-1)
    valid = target != -100
    safe_t = jnp.where(valid, target, 0)
    ce = -jnp.take_along_axis(logp, safe_t[None, :, None], axis=-1)[..., 0]
    ce = ce * valid[None, :].astype(jnp.float32)
    CE = jnp.mean(sum(ce[i] * g[i] for i in range(5)))
    b = sum(b_stacked[i] * g[i][:, None] for i in range(5))
    return (b, CE, val_time) + tuple(e[i] for i in range(5))


if __name__ == "__main__":
    key = jax.random.PRNGKey(0)
    E, N, C = NUM_EXITS, 16, 128   # small, lane-aligned demo shapes

    k_logits, k_target = jax.random.split(key)
    # Scale spreads max(softmax) widely so both early-exit and fall-through
    # gate paths are exercised.
    b_stacked = 4.0 * jax.random.normal(k_logits, (E, N, C), dtype=jnp.float32)
    target = jax.random.randint(k_target, (N,), 0, C, dtype=jnp.int32)
    target = target.at[3].set(-100)   # exercise ignore_index path

    thresholds = (0.5, 0.6, 0.7, 0.8, 1.0)
    b_times = (1.0, 2.0, 3.0, 4.0, 5.0)

    out = msd_val_loss(b_stacked, target, thresholds, b_times)
    out = jax.block_until_ready(out)

    b, CE, val_time, e_1, e_2, e_3, e_4, e_5 = out
    assert b.shape == (N, C)
    assert CE.shape == () and val_time.shape == ()
    assert e_1.shape == (N,)

    ref = _reference(b_stacked, target, thresholds, b_times)
    for got, want in zip(out, ref):
        want = jnp.asarray(want)
        assert jnp.allclose(got, want, atol=1e-4, rtol=1e-4), (
            float(jnp.max(jnp.abs(got - want))))

    print("KERNEL_OK")
</pallas_src>

<mosaic_0001>
module attributes {stable_mosaic.version = 11 : i64} {
  func.func @kernel(%arg0: i32, %arg1: memref<5x16x128xf32, #tpu.memory_space<vmem>>, %arg2: memref<16x1xi32, #tpu.memory_space<vmem>>, %arg3: memref<16x128xf32, #tpu.memory_space<vmem>>, %arg4: memref<16x7xf32, #tpu.memory_space<vmem>>) attributes {dimension_semantics = [#tpu.dimension_semantics<parallel>], iteration_bounds = array<i64: 1>, scalar_prefetch = 0 : i64, scratch_operands = 0 : i64, tpu.core_type = #tpu.core_type<tc>, window_params = [{transform_indices = @transform_0, window_bounds = array<i64: 5, 16, 128>}, {transform_indices = @transform_1, window_bounds = array<i64: 16, 1>}, {transform_indices = @transform_2, window_bounds = array<i64: 16, 128>}, {transform_indices = @transform_3, window_bounds = array<i64: 16, 7>}]} {
    %c0 = arith.constant 0 : index
    %c0_0 = arith.constant 0 : index
    %0 = vector.load %arg2[%c0, %c0_0] : memref<16x1xi32, #tpu.memory_space<vmem>>, vector<16x1xi32>
    %1 = tpu.iota {dimensions = array<i32: 1>} : vector<16x128xi32>
    %2 = vector.broadcast %0 : vector<16x1xi32> to vector<16x128xi32>
    %3 = arith.cmpi eq, %1, %2 : vector<16x128xi32>
    %c-100_i32 = arith.constant -100 : i32
    %4 = vector.broadcast %c-100_i32 : i32 to vector<16x1xi32>
    %5 = arith.cmpi ne, %0, %4 : vector<16x1xi32>
    %6 = arith.extui %5 : vector<16x1xi1> to vector<16x1xi32>
    %7 = arith.sitofp %6 : vector<16x1xi32> to vector<16x1xf32>
    %cst = arith.constant 1.000000e+00 : f32
    %8 = vector.broadcast %cst : f32 to vector<128x8xf32>
    %c0_1 = arith.constant 0 : index
    %c0_2 = arith.constant 0 : index
    %c0_3 = arith.constant 0 : index
    %9 = vector.load %arg1[%c0_1, %c0_2, %c0_3] : memref<5x16x128xf32, #tpu.memory_space<vmem>>, vector<1x16x128xf32>
    %10 = vector.shape_cast %9 : vector<1x16x128xf32> to vector<16x128xf32>
    %cst_4 = arith.constant dense<0xFF800000> : vector<16xf32>
    %11 = vector.multi_reduction <maximumf>, %10, %cst_4 [1] : vector<16x128xf32> to vector<16xf32>
    %12 = vector.shape_cast %11 : vector<16xf32> to vector<16x1xf32>
    %13 = vector.broadcast %12 : vector<16x1xf32> to vector<16x128xf32>
    %14 = arith.subf %10, %13 : vector<16x128xf32>
    %15 = math.exp %14 : vector<16x128xf32>
    %cst_5 = arith.constant dense<0.000000e+00> : vector<16x8xf32>
    %16 = tpu.matmul %15, %8, %cst_5 {dimension_numbers = #tpu.dot_dimension_numbers<[1], [0], [0], [1], [0, 0, 1, 1], [], []>, precision = #tpu.contract_precision<fp32>} : vector<16x128xf32>, vector<128x8xf32>, vector<16x8xf32> -> vector<16x8xf32>
    %17 = vector.extract_strided_slice %16 {offsets = [0, 0], sizes = [16, 1], strides = [1, 1]} : vector<16x8xf32> to vector<16x1xf32>
    %18 = tpu.reciprocal %17 : vector<16x1xf32> -> vector<16x1xf32>
    %cst_6 = arith.constant 0.000000e+00 : f32
    %19 = vector.broadcast %cst_6 : f32 to vector<16x1xf32>
    %20 = arith.subf %19, %18 : vector<16x1xf32>
    %cst_7 = arith.constant 0.000000e+00 : f32
    %21 = vector.broadcast %cst_7 : f32 to vector<16x128xf32>
    %22 = arith.select %3, %10, %21 : vector<16x128xi1>, vector<16x128xf32>
    %cst_8 = arith.constant dense<0.000000e+00> : vector<16x8xf32>
    %23 = tpu.matmul %22, %8, %cst_8 {dimension_numbers = #tpu.dot_dimension_numbers<[1], [0], [0], [1], [0, 0, 1, 1], [], []>, precision = #tpu.contract_precision<fp32>} : vector<16x128xf32>, vector<128x8xf32>, vector<16x8xf32> -> vector<16x8xf32>
    %24 = vector.extract_strided_slice %23 {offsets = [0, 0], sizes = [16, 1], strides = [1, 1]} : vector<16x8xf32> to vector<16x1xf32>
    %25 = math.log %17 : vector<16x1xf32>
    %26 = arith.addf %12, %25 : vector<16x1xf32>
    %27 = arith.subf %26, %24 : vector<16x1xf32>
    %28 = arith.mulf %27, %7 : vector<16x1xf32>
    %c1 = arith.constant 1 : index
    %c0_9 = arith.constant 0 : index
    %c0_10 = arith.constant 0 : index
    %29 = vector.load %arg1[%c1, %c0_9, %c0_10] : memref<5x16x128xf32, #tpu.memory_space<vmem>>, vector<1x16x128xf32>
    %30 = vector.shape_cast %29 : vector<1x16x128xf32> to vector<16x128xf32>
    %cst_11 = arith.constant dense<0xFF800000> : vector<16xf32>
    %31 = vector.multi_reduction <maximumf>, %30, %cst_11 [1] : vector<16x128xf32> to vector<16xf32>
    %32 = vector.shape_cast %31 : vector<16xf32> to vector<16x1xf32>
    %33 = vector.broadcast %32 : vector<16x1xf32> to vector<16x128xf32>
    %34 = arith.subf %30, %33 : vector<16x128xf32>
    %35 = math.exp %34 : vector<16x128xf32>
    %cst_12 = arith.constant dense<0.000000e+00> : vector<16x8xf32>
    %36 = tpu.matmul %35, %8, %cst_12 {dimension_numbers = #tpu.dot_dimension_numbers<[1], [0], [0], [1], [0, 0, 1, 1], [], []>, precision = #tpu.contract_precision<fp32>} : vector<16x128xf32>, vector<128x8xf32>, vector<16x8xf32> -> vector<16x8xf32>
    %37 = vector.extract_strided_slice %36 {offsets = [0, 0], sizes = [16, 1], strides = [1, 1]} : vector<16x8xf32> to vector<16x1xf32>
    %38 = tpu.reciprocal %37 : vector<16x1xf32> -> vector<16x1xf32>
    %cst_13 = arith.constant 0.000000e+00 : f32
    %39 = vector.broadcast %cst_13 : f32 to vector<16x1xf32>
    %40 = arith.subf %39, %38 : vector<16x1xf32>
    %cst_14 = arith.constant 0.000000e+00 : f32
    %41 = vector.broadcast %cst_14 : f32 to vector<16x128xf32>
    %42 = arith.select %3, %30, %41 : vector<16x128xi1>, vector<16x128xf32>
    %cst_15 = arith.constant dense<0.000000e+00> : vector<16x8xf32>
    %43 = tpu.matmul %42, %8, %cst_15 {dimension_numbers = #tpu.dot_dimension_numbers<[1], [0], [0], [1], [0, 0, 1, 1], [], []>, precision = #tpu.contract_precision<fp32>} : vector<16x128xf32>, vector<128x8xf32>, vector<16x8xf32> -> vector<16x8xf32>
    %44 = vector.extract_strided_slice %43 {offsets = [0, 0], sizes = [16, 1], strides = [1, 1]} : vector<16x8xf32> to vector<16x1xf32>
    %45 = math.log %37 : vector<16x1xf32>
    %46 = arith.addf %32, %45 : vector<16x1xf32>
    %47 = arith.subf %46, %44 : vector<16x1xf32>
    %48 = arith.mulf %47, %7 : vector<16x1xf32>
    %c2 = arith.constant 2 : index
    %c0_16 = arith.constant 0 : index
    %c0_17 = arith.constant 0 : index
    %49 = vector.load %arg1[%c2, %c0_16, %c0_17] : memref<5x16x128xf32, #tpu.memory_space<vmem>>, vector<1x16x128xf32>
    %50 = vector.shape_cast %49 : vector<1x16x128xf32> to vector<16x128xf32>
    %cst_18 = arith.constant dense<0xFF800000> : vector<16xf32>
    %51 = vector.multi_reduction <maximumf>, %50, %cst_18 [1] : vector<16x128xf32> to vector<16xf32>
    %52 = vector.shape_cast %51 : vector<16xf32> to vector<16x1xf32>
    %53 = vector.broadcast %52 : vector<16x1xf32> to vector<16x128xf32>
    %54 = arith.subf %50, %53 : vector<16x128xf32>
    %55 = math.exp %54 : vector<16x128xf32>
    %cst_19 = arith.constant dense<0.000000e+00> : vector<16x8xf32>
    %56 = tpu.matmul %55, %8, %cst_19 {dimension_numbers = #tpu.dot_dimension_numbers<[1], [0], [0], [1], [0, 0, 1, 1], [], []>, precision = #tpu.contract_precision<fp32>} : vector<16x128xf32>, vector<128x8xf32>, vector<16x8xf32> -> vector<16x8xf32>
    %57 = vector.extract_strided_slice %56 {offsets = [0, 0], sizes = [16, 1], strides = [1, 1]} : vector<16x8xf32> to vector<16x1xf32>
    %58 = tpu.reciprocal %57 : vector<16x1xf32> -> vector<16x1xf32>
    %cst_20 = arith.constant 0.000000e+00 : f32
    %59 = vector.broadcast %cst_20 : f32 to vector<16x1xf32>
    %60 = arith.subf %59, %58 : vector<16x1xf32>
    %cst_21 = arith.constant 0.000000e+00 : f32
    %61 = vector.broadcast %cst_21 : f32 to vector<16x128xf32>
    %62 = arith.select %3, %50, %61 : vector<16x128xi1>, vector<16x128xf32>
    %cst_22 = arith.constant dense<0.000000e+00> : vector<16x8xf32>
    %63 = tpu.matmul %62, %8, %cst_22 {dimension_numbers = #tpu.dot_dimension_numbers<[1], [0], [0], [1], [0, 0, 1, 1], [], []>, precision = #tpu.contract_precision<fp32>} : vector<16x128xf32>, vector<128x8xf32>, vector<16x8xf32> -> vector<16x8xf32>
    %64 = vector.extract_strided_slice %63 {offsets = [0, 0], sizes = [16, 1], strides = [1, 1]} : vector<16x8xf32> to vector<16x1xf32>
    %65 = math.log %57 : vector<16x1xf32>
    %66 = arith.addf %52, %65 : vector<16x1xf32>
    %67 = arith.subf %66, %64 : vector<16x1xf32>
    %68 = arith.mulf %67, %7 : vector<16x1xf32>
    %c3 = arith.constant 3 : index
    %c0_23 = arith.constant 0 : index
    %c0_24 = arith.constant 0 : index
    %69 = vector.load %arg1[%c3, %c0_23, %c0_24] : memref<5x16x128xf32, #tpu.memory_space<vmem>>, vector<1x16x128xf32>
    %70 = vector.shape_cast %69 : vector<1x16x128xf32> to vector<16x128xf32>
    %cst_25 = arith.constant dense<0xFF800000> : vector<16xf32>
    %71 = vector.multi_reduction <maximumf>, %70, %cst_25 [1] : vector<16x128xf32> to vector<16xf32>
    %72 = vector.shape_cast %71 : vector<16xf32> to vector<16x1xf32>
    %73 = vector.broadcast %72 : vector<16x1xf32> to vector<16x128xf32>
    %74 = arith.subf %70, %73 : vector<16x128xf32>
    %75 = math.exp %74 : vector<16x128xf32>
    %cst_26 = arith.constant dense<0.000000e+00> : vector<16x8xf32>
    %76 = tpu.matmul %75, %8, %cst_26 {dimension_numbers = #tpu.dot_dimension_numbers<[1], [0], [0], [1], [0, 0, 1, 1], [], []>, precision = #tpu.contract_precision<fp32>} : vector<16x128xf32>, vector<128x8xf32>, vector<16x8xf32> -> vector<16x8xf32>
    %77 = vector.extract_strided_slice %76 {offsets = [0, 0], sizes = [16, 1], strides = [1, 1]} : vector<16x8xf32> to vector<16x1xf32>
    %78 = tpu.reciprocal %77 : vector<16x1xf32> -> vector<16x1xf32>
    %cst_27 = arith.constant 0.000000e+00 : f32
    %79 = vector.broadcast %cst_27 : f32 to vector<16x1xf32>
    %80 = arith.subf %79, %78 : vector<16x1xf32>
    %cst_28 = arith.constant 0.000000e+00 : f32
    %81 = vector.broadcast %cst_28 : f32 to vector<16x128xf32>
    %82 = arith.select %3, %70, %81 : vector<16x128xi1>, vector<16x128xf32>
    %cst_29 = arith.constant dense<0.000000e+00> : vector<16x8xf32>
    %83 = tpu.matmul %82, %8, %cst_29 {dimension_numbers = #tpu.dot_dimension_numbers<[1], [0], [0], [1], [0, 0, 1, 1], [], []>, precision = #tpu.contract_precision<fp32>} : vector<16x128xf32>, vector<128x8xf32>, vector<16x8xf32> -> vector<16x8xf32>
    %84 = vector.extract_strided_slice %83 {offsets = [0, 0], sizes = [16, 1], strides = [1, 1]} : vector<16x8xf32> to vector<16x1xf32>
    %85 = math.log %77 : vector<16x1xf32>
    %86 = arith.addf %72, %85 : vector<16x1xf32>
    %87 = arith.subf %86, %84 : vector<16x1xf32>
    %88 = arith.mulf %87, %7 : vector<16x1xf32>
    %c4 = arith.constant 4 : index
    %c0_30 = arith.constant 0 : index
    %c0_31 = arith.constant 0 : index
    %89 = vector.load %arg1[%c4, %c0_30, %c0_31] : memref<5x16x128xf32, #tpu.memory_space<vmem>>, vector<1x16x128xf32>
    %90 = vector.shape_cast %89 : vector<1x16x128xf32> to vector<16x128xf32>
    %cst_32 = arith.constant dense<0xFF800000> : vector<16xf32>
    %91 = vector.multi_reduction <maximumf>, %90, %cst_32 [1] : vector<16x128xf32> to vector<16xf32>
    %92 = vector.shape_cast %91 : vector<16xf32> to vector<16x1xf32>
    %93 = vector.broadcast %92 : vector<16x1xf32> to vector<16x128xf32>
    %94 = arith.subf %90, %93 : vector<16x128xf32>
    %95 = math.exp %94 : vector<16x128xf32>
    %cst_33 = arith.constant dense<0.000000e+00> : vector<16x8xf32>
    %96 = tpu.matmul %95, %8, %cst_33 {dimension_numbers = #tpu.dot_dimension_numbers<[1], [0], [0], [1], [0, 0, 1, 1], [], []>, precision = #tpu.contract_precision<fp32>} : vector<16x128xf32>, vector<128x8xf32>, vector<16x8xf32> -> vector<16x8xf32>
    %97 = vector.extract_strided_slice %96 {offsets = [0, 0], sizes = [16, 1], strides = [1, 1]} : vector<16x8xf32> to vector<16x1xf32>
    %98 = tpu.reciprocal %97 : vector<16x1xf32> -> vector<16x1xf32>
    %cst_34 = arith.constant 0.000000e+00 : f32
    %99 = vector.broadcast %cst_34 : f32 to vector<16x1xf32>
    %100 = arith.subf %99, %98 : vector<16x1xf32>
    %cst_35 = arith.constant 0.000000e+00 : f32
    %101 = vector.broadcast %cst_35 : f32 to vector<16x128xf32>
    %102 = arith.select %3, %90, %101 : vector<16x128xi1>, vector<16x128xf32>
    %cst_36 = arith.constant dense<0.000000e+00> : vector<16x8xf32>
    %103 = tpu.matmul %102, %8, %cst_36 {dimension_numbers = #tpu.dot_dimension_numbers<[1], [0], [0], [1], [0, 0, 1, 1], [], []>, precision = #tpu.contract_precision<fp32>} : vector<16x128xf32>, vector<128x8xf32>, vector<16x8xf32> -> vector<16x8xf32>
    %104 = vector.extract_strided_slice %103 {offsets = [0, 0], sizes = [16, 1], strides = [1, 1]} : vector<16x8xf32> to vector<16x1xf32>
    %105 = math.log %97 : vector<16x1xf32>
    %106 = arith.addf %92, %105 : vector<16x1xf32>
    %107 = arith.subf %106, %104 : vector<16x1xf32>
    %108 = arith.mulf %107, %7 : vector<16x1xf32>
    %cst_37 = arith.constant -5.000000e-01 : f32
    %109 = vector.broadcast %cst_37 : f32 to vector<16x1xf32>
    %110 = arith.subf %20, %109 : vector<16x1xf32>
    %cst_38 = arith.constant 0.000000e+00 : f32
    %111 = vector.broadcast %cst_38 : f32 to vector<16x1xf32>
    %112 = arith.cmpf oge, %110, %111 : vector<16x1xf32>
    %cst_39 = arith.constant -6.000000e-01 : f32
    %113 = vector.broadcast %cst_39 : f32 to vector<16x1xf32>
    %114 = arith.subf %40, %113 : vector<16x1xf32>
    %cst_40 = arith.constant 0.000000e+00 : f32
    %115 = vector.broadcast %cst_40 : f32 to vector<16x1xf32>
    %116 = arith.cmpf oge, %114, %115 : vector<16x1xf32>
    %cst_41 = arith.constant -0.699999988 : f32
    %117 = vector.broadcast %cst_41 : f32 to vector<16x1xf32>
    %118 = arith.subf %60, %117 : vector<16x1xf32>
    %cst_42 = arith.constant 0.000000e+00 : f32
    %119 = vector.broadcast %cst_42 : f32 to vector<16x1xf32>
    %120 = arith.cmpf oge, %118, %119 : vector<16x1xf32>
    %cst_43 = arith.constant -5.000000e-01 : f32
    %121 = vector.broadcast %cst_43 : f32 to vector<16x1xf32>
    %122 = arith.subf %121, %20 : vector<16x1xf32>
    %cst_44 = arith.constant 0.000000e+00 : f32
    %123 = vector.broadcast %cst_44 : f32 to vector<16x1xf32>
    %124 = arith.cmpf ogt, %122, %123 : vector<16x1xf32>
    %cst_45 = arith.constant -6.000000e-01 : f32
    %125 = vector.broadcast %cst_45 : f32 to vector<16x1xf32>
    %126 = arith.subf %125, %40 : vector<16x1xf32>
    %cst_46 = arith.constant 0.000000e+00 : f32
    %127 = vector.broadcast %cst_46 : f32 to vector<16x1xf32>
    %128 = arith.cmpf ogt, %126, %127 : vector<16x1xf32>
    %129 = arith.andi %128, %112 : vector<16x1xi1>
    %cst_47 = arith.constant -0.699999988 : f32
    %130 = vector.broadcast %cst_47 : f32 to vector<16x1xf32>
    %131 = arith.subf %130, %60 : vector<16x1xf32>
    %cst_48 = arith.constant 0.000000e+00 : f32
    %132 = vector.broadcast %cst_48 : f32 to vector<16x1xf32>
    %133 = arith.cmpf ogt, %131, %132 : vector<16x1xf32>
    %134 = arith.andi %133, %112 : vector<16x1xi1>
    %135 = arith.andi %134, %116 : vector<16x1xi1>
    %cst_49 = arith.constant -8.000000e-01 : f32
    %136 = vector.broadcast %cst_49 : f32 to vector<16x1xf32>
    %137 = arith.subf %136, %80 : vector<16x1xf32>
    %cst_50 = arith.constant 0.000000e+00 : f32
    %138 = vector.broadcast %cst_50 : f32 to vector<16x1xf32>
    %139 = arith.cmpf ogt, %137, %138 : vector<16x1xf32>
    %140 = arith.andi %139, %112 : vector<16x1xi1>
    %141 = arith.andi %140, %116 : vector<16x1xi1>
    %142 = arith.andi %141, %120 : vector<16x1xi1>
    %cst_51 = arith.constant -8.000000e-01 : f32
    %143 = vector.broadcast %cst_51 : f32 to vector<16x1xf32>
    %144 = arith.subf %80, %143 : vector<16x1xf32>
    %cst_52 = arith.constant 0.000000e+00 : f32
    %145 = vector.broadcast %cst_52 : f32 to vector<16x1xf32>
    %146 = arith.cmpf oge, %144, %145 : vector<16x1xf32>
    %147 = arith.andi %146, %112 : vector<16x1xi1>
    %148 = arith.andi %147, %116 : vector<16x1xi1>
    %149 = arith.andi %148, %120 : vector<16x1xi1>
    %150 = arith.extui %124 : vector<16x1xi1> to vector<16x1xi32>
    %151 = arith.sitofp %150 : vector<16x1xi32> to vector<16x1xf32>
    %152 = arith.extui %129 : vector<16x1xi1> to vector<16x1xi32>
    %153 = arith.sitofp %152 : vector<16x1xi32> to vector<16x1xf32>
    %154 = arith.extui %135 : vector<16x1xi1> to vector<16x1xi32>
    %155 = arith.sitofp %154 : vector<16x1xi32> to vector<16x1xf32>
    %156 = arith.extui %142 : vector<16x1xi1> to vector<16x1xi32>
    %157 = arith.sitofp %156 : vector<16x1xi32> to vector<16x1xf32>
    %158 = arith.extui %149 : vector<16x1xi1> to vector<16x1xi32>
    %159 = arith.sitofp %158 : vector<16x1xi32> to vector<16x1xf32>
    %cst_53 = arith.constant 1.000000e+00 : f32
    %160 = vector.broadcast %cst_53 : f32 to vector<16x1xf32>
    %161 = arith.mulf %160, %151 : vector<16x1xf32>
    %cst_54 = arith.constant 0.000000e+00 : f32
    %162 = vector.broadcast %cst_54 : f32 to vector<16x1xf32>
    %163 = arith.addf %162, %161 : vector<16x1xf32>
    %cst_55 = arith.constant 2.000000e+00 : f32
    %164 = vector.broadcast %cst_55 : f32 to vector<16x1xf32>
    %165 = arith.mulf %164, %153 : vector<16x1xf32>
    %166 = arith.addf %163, %165 : vector<16x1xf32>
    %cst_56 = arith.constant 3.000000e+00 : f32
    %167 = vector.broadcast %cst_56 : f32 to vector<16x1xf32>
    %168 = arith.mulf %167, %155 : vector<16x1xf32>
    %169 = arith.addf %166, %168 : vector<16x1xf32>
    %cst_57 = arith.constant 4.000000e+00 : f32
    %170 = vector.broadcast %cst_57 : f32 to vector<16x1xf32>
    %171 = arith.mulf %170, %157 : vector<16x1xf32>
    %172 = arith.addf %169, %171 : vector<16x1xf32>
    %cst_58 = arith.constant 5.000000e+00 : f32
    %173 = vector.broadcast %cst_58 : f32 to vector<16x1xf32>
    %174 = arith.mulf %173, %159 : vector<16x1xf32>
    %175 = arith.addf %172, %174 : vector<16x1xf32>
    %176 = arith.mulf %28, %151 : vector<16x1xf32>
    %cst_59 = arith.constant 0.000000e+00 : f32
    %177 = vector.broadcast %cst_59 : f32 to vector<16x1xf32>
    %178 = arith.addf %177, %176 : vector<16x1xf32>
    %179 = arith.mulf %48, %153 : vector<16x1xf32>
    %180 = arith.addf %178, %179 : vector<16x1xf32>
    %181 = arith.mulf %68, %155 : vector<16x1xf32>
    %182 = arith.addf %180, %181 : vector<16x1xf32>
    %183 = arith.mulf %88, %157 : vector<16x1xf32>
    %184 = arith.addf %182, %183 : vector<16x1xf32>
    %185 = arith.mulf %108, %159 : vector<16x1xf32>
    %186 = arith.addf %184, %185 : vector<16x1xf32>
    %c4_60 = arith.constant 4 : index
    %c0_61 = arith.constant 0 : index
    %c0_62 = arith.constant 0 : index
    %187 = vector.load %arg1[%c4_60, %c0_61, %c0_62] : memref<5x16x128xf32, #tpu.memory_space<vmem>>, vector<1x16x128xf32>
    %188 = vector.shape_cast %187 : vector<1x16x128xf32> to vector<16x128xf32>
    %c3_63 = arith.constant 3 : index
    %c0_64 = arith.constant 0 : index
    %c0_65 = arith.constant 0 : index
    %189 = vector.load %arg1[%c3_63, %c0_64, %c0_65] : memref<5x16x128xf32, #tpu.memory_space<vmem>>, vector<1x16x128xf32>
    %190 = vector.shape_cast %189 : vector<1x16x128xf32> to vector<16x128xf32>
    %191 = vector.shape_cast %142 : vector<16x1xi1> to vector<16x1xi1>
    %192 = vector.broadcast %191 : vector<16x1xi1> to vector<16x128xi1>
    %193 = arith.select %192, %190, %188 : vector<16x128xi1>, vector<16x128xf32>
    %c2_66 = arith.constant 2 : index
    %c0_67 = arith.constant 0 : index
    %c0_68 = arith.constant 0 : index
    %194 = vector.load %arg1[%c2_66, %c0_67, %c0_68] : memref<5x16x128xf32, #tpu.memory_space<vmem>>, vector<1x16x128xf32>
    %195 = vector.shape_cast %194 : vector<1x16x128xf32> to vector<16x128xf32>
    %196 = vector.shape_cast %135 : vector<16x1xi1> to vector<16x1xi1>
    %197 = vector.broadcast %196 : vector<16x1xi1> to vector<16x128xi1>
    %198 = arith.select %197, %195, %193 : vector<16x128xi1>, vector<16x128xf32>
    %c1_69 = arith.constant 1 : index
    %c0_70 = arith.constant 0 : index
    %c0_71 = arith.constant 0 : index
    %199 = vector.load %arg1[%c1_69, %c0_70, %c0_71] : memref<5x16x128xf32, #tpu.memory_space<vmem>>, vector<1x16x128xf32>
    %200 = vector.shape_cast %199 : vector<1x16x128xf32> to vector<16x128xf32>
    %201 = vector.shape_cast %129 : vector<16x1xi1> to vector<16x1xi1>
    %202 = vector.broadcast %201 : vector<16x1xi1> to vector<16x128xi1>
    %203 = arith.select %202, %200, %198 : vector<16x128xi1>, vector<16x128xf32>
    %c0_72 = arith.constant 0 : index
    %c0_73 = arith.constant 0 : index
    %c0_74 = arith.constant 0 : index
    %204 = vector.load %arg1[%c0_72, %c0_73, %c0_74] : memref<5x16x128xf32, #tpu.memory_space<vmem>>, vector<1x16x128xf32>
    %205 = vector.shape_cast %204 : vector<1x16x128xf32> to vector<16x128xf32>
    %206 = vector.shape_cast %124 : vector<16x1xi1> to vector<16x1xi1>
    %207 = vector.broadcast %206 : vector<16x1xi1> to vector<16x128xi1>
    %208 = arith.select %207, %205, %203 : vector<16x128xi1>, vector<16x128xf32>
    %c0_75 = arith.constant 0 : index
    %c0_76 = arith.constant 0 : index
    %209 = vector.load %arg3[%c0_75, %c0_76] : memref<16x128xf32, #tpu.memory_space<vmem>>, vector<16x128xf32>
    tpu.vector_store %arg3[%c0_75, %c0_76], %208 {strides = array<i32>} : memref<16x128xf32, #tpu.memory_space<vmem>>, vector<16x128xf32>,
    %210 = tpu.iota {dimensions = array<i32: 1>} : vector<16x7xi32>
    %cst_77 = arith.constant 0.000000e+00 : f32
    %211 = vector.broadcast %cst_77 : f32 to vector<16x7xf32>
    %c0_i32 = arith.constant 0 : i32
    %212 = vector.broadcast %c0_i32 : i32 to vector<16x7xi32>
    %213 = arith.cmpi eq, %210, %212 : vector<16x7xi32>
    %214 = vector.shape_cast %20 : vector<16x1xf32> to vector<16x1xf32>
    %215 = vector.broadcast %214 : vector<16x1xf32> to vector<16x7xf32>
    %216 = arith.select %213, %215, %211 : vector<16x7xi1>, vector<16x7xf32>
    %c1_i32 = arith.constant 1 : i32
    %217 = vector.broadcast %c1_i32 : i32 to vector<16x7xi32>
    %218 = arith.cmpi eq, %210, %217 : vector<16x7xi32>
    %219 = vector.shape_cast %40 : vector<16x1xf32> to vector<16x1xf32>
    %220 = vector.broadcast %219 : vector<16x1xf32> to vector<16x7xf32>
    %221 = arith.select %218, %220, %216 : vector<16x7xi1>, vector<16x7xf32>
    %c2_i32 = arith.constant 2 : i32
    %222 = vector.broadcast %c2_i32 : i32 to vector<16x7xi32>
    %223 = arith.cmpi eq, %210, %222 : vector<16x7xi32>
    %224 = vector.shape_cast %60 : vector<16x1xf32> to vector<16x1xf32>
    %225 = vector.broadcast %224 : vector<16x1xf32> to vector<16x7xf32>
    %226 = arith.select %223, %225, %221 : vector<16x7xi1>, vector<16x7xf32>
    %c3_i32 = arith.constant 3 : i32
    %227 = vector.broadcast %c3_i32 : i32 to vector<16x7xi32>
    %228 = arith.cmpi eq, %210, %227 : vector<16x7xi32>
    %229 = vector.shape_cast %80 : vector<16x1xf32> to vector<16x1xf32>
    %230 = vector.broadcast %229 : vector<16x1xf32> to vector<16x7xf32>
    %231 = arith.select %228, %230, %226 : vector<16x7xi1>, vector<16x7xf32>
    %c4_i32 = arith.constant 4 : i32
    %232 = vector.broadcast %c4_i32 : i32 to vector<16x7xi32>
    %233 = arith.cmpi eq, %210, %232 : vector<16x7xi32>
    %234 = vector.shape_cast %100 : vector<16x1xf32> to vector<16x1xf32>
    %235 = vector.broadcast %234 : vector<16x1xf32> to vector<16x7xf32>
    %236 = arith.select %233, %235, %231 : vector<16x7xi1>, vector<16x7xf32>
    %c5_i32 = arith.constant 5 : i32
    %237 = vector.broadcast %c5_i32 : i32 to vector<16x7xi32>
    %238 = arith.cmpi eq, %210, %237 : vector<16x7xi32>
    %239 = vector.shape_cast %186 : vector<16x1xf32> to vector<16x1xf32>
    %240 = vector.broadcast %239 : vector<16x1xf32> to vector<16x7xf32>
    %241 = arith.select %238, %240, %236 : vector<16x7xi1>, vector<16x7xf32>
    %c6_i32 = arith.constant 6 : i32
    %242 = vector.broadcast %c6_i32 : i32 to vector<16x7xi32>
    %243 = arith.cmpi eq, %210, %242 : vector<16x7xi32>
    %244 = vector.shape_cast %175 : vector<16x1xf32> to vector<16x1xf32>
    %245 = vector.broadcast %244 : vector<16x1xf32> to vector<16x7xf32>
    %246 = arith.select %243, %245, %241 : vector<16x7xi1>, vector<16x7xf32>
    %c0_78 = arith.constant 0 : index
    %c0_79 = arith.constant 0 : index
    %247 = vector.load %arg4[%c0_78, %c0_79] : memref<16x7xf32, #tpu.memory_space<vmem>>, vector<16x7xf32>
    tpu.vector_store %arg4[%c0_78, %c0_79], %246 {strides = array<i32>} : memref<16x7xf32, #tpu.memory_space<vmem>>, vector<16x7xf32>,
    return
  }
  func.func @transform_0(%arg0: i32) -> (i32, i32, i32) {
    %c0_i32 = arith.constant 0 : i32
    %c0_i32_0 = arith.constant 0 : i32
    %c0_i32_1 = arith.constant 0 : i32
    return %c0_i32, %arg0, %c0_i32_0 : i32, i32, i32
  }
  func.func @transform_1(%arg0: i32) -> (i32, i32) {
    %c0_i32 = arith.constant 0 : i32
    %c0_i32_0 = arith.constant 0 : i32
    return %arg0, %c0_i32 : i32, i32
  }
  func.func @transform_2(%arg0: i32) -> (i32, i32) {
    %c0_i32 = arith.constant 0 : i32
    %c0_i32_0 = arith.constant 0 : i32
    return %arg0, %c0_i32 : i32, i32
  }
  func.func @transform_3(%arg0: i32) -> (i32, i32) {
    %c0_i32 = arith.constant 0 : i32
    %c0_i32_0 = arith.constant 0 : i32
    return %arg0, %c0_i32 : i32, i32
  }
}

</mosaic_0001>

<bundles_post_ra>
// kernel: msd_val_loss.1
= control target key start
LH: loop header
LB: loop body
LE: loop exit
PB: predicated region body
PF: predicated region fallthrough
CT: control target
= control target key end

     0   :  { %9 = vsyncpa [#allocation3], 0  ;;  %s8996_s0 = inlined_call_operand.hbm [shape: f32[5,16,128], index: 0, kind: input, shape index: {}]   ;;  %s8997_s1 = inlined_call_operand.vmem [shape: s32[16,1], index: 1, kind: input, shape index: {}]   ;;  %s8998_s2 = inlined_call_operand.hbm [shape: f32[16,128], index: 2, kind: output, shape index: {0}]   ;;  %s8999_s3 = inlined_call_operand.vmem [shape: f32[16,7], index: 3, kind: output, shape index: {1}]  }
   0x1   :  { %10 = vsyncpa [#allocation4], 0  ;;  %s7775_s12 = smov [#allocation2]   ;;  %s7727_s16 = scalar_lea.hbm %s8996_s0, 1280 }
   0x2   :  { %s16_s13 = sshll.u32 %s7775_s12, 4  ;;  %p7728_p0 = scmp.ne.s32.totalorder %s8996_s0, %s7727_s16  ;;  %s17_s13 = int_to_ptr.vmem [resolvable:$true] %s16_s13 }
   0x3   :  { %p7731_p1 = scmp.lt.u32.totalorder %s7727_s16, %s8996_s0 }
   0x5   :  { %p7733_p2 = pnand %p7731_p1, %p7728_p0 }
   0x7   :  { %7736 = shalt.err (!%p7733_p2)
}
   0x8   :  { %s7737_s21 = scalar_lea.vmem %s17_s13, 1280  ;;  %p7742_p4 = scmp.lt.s32.totalorder %s17_s13, %s17_s13 }
   0x9   :  { %p7738_p3 = scmp.ne.s32.totalorder %s17_s13, %s7737_s21  ;;  %p7743_p5 = scmp.lt.s32.totalorder %s7737_s21, %s7737_s21 }
   0xb   :  { %p7744_p6 = por %p7743_p5, %p7742_p4 }
   0xd   :  { %p7745_p7 = pnand %p7744_p6, %p7738_p3 }
   0xf   :  { %7748 = shalt.err (!%p7745_p7)
}
  0x10   :  { %s7776_s22 = smov 128   ;;  %s7777_s23 = smov 8  }
  0x11   :  { %22 = dma.hbm_to_vmem [thread:$0]  %s8996_s0, 1280, %s17_s13, [#allocation3], %s7776_s22, %s7776_s22, %s7777_s23  }
  0x12   :  { %7771 = dma.done.wait [#allocation3], 1280  }
  0x13   :  { %7772 = vsyncadd [#allocation3], 4294966016  ;;  %v7778_v0 = vmov 0   ;;  %v7779_v1 = vmov 1.0|1.0   ;;  %v7826_v2 = vld [vmem:[#allocation2] sm:$0xff]  ;;  %v30_v15 = vlaneseq }
  0x14   :  { %7652 = vset.pattern.permute.xlu1 %v7778_v0  ;;  %7113 = vmatprep.subr.bf16.mxu1 %v7779_v1  ;;  %v28_v3 = vld [vmem:[%s8997_s1] sm:$0xff]  ;;  %v7834_v4 = vld [vmem:[#allocation2 + $0x8] sm:$0xff]  ;;  %v7844_v6 = vld [vmem:[#allocation2 + $0x10] sm:$0xff]  ;;  %v7780_v7 = vmov 0.0  }
  0x15   :  { %7114 = vmatpush3.bf16.msra.mxu1 %v7779_v1  ;;  %7065 = vmatprep.subr.bf16.mxu0 %v7779_v1  ;;  %v29_v5 = vld [vmem:[%s8997_s1 + $0x8] sm:$0xff]  ;;  %v7868_v8 = vld [vmem:[#allocation2 + $0x18] sm:$0xff]  ;;  %v7871_v9 = vld [vmem:[#allocation2 + $0x20] sm:$0xff]  ;;  %v7883_v16 = vand.u32 127, %v30_v15 }
  0x16   :  { %7115 = vmatprep.subr.bf16.mxu1 %v7779_v1  ;;  %7066 = vmatpush3.bf16.msra.mxu0 %v7779_v1  ;;  %v7874_v10 = vld [vmem:[#allocation2 + $0x28] sm:$0xff]  ;;  %v7877_v11 = vld [vmem:[#allocation2 + $0x30] sm:$0xff]  ;;  %v7880_v12 = vld [vmem:[#allocation2 + $0x38] sm:$0xff] }
  0x17   :  { %7067 = vmatprep.subr.bf16.mxu0 %v7779_v1  ;;  %7653 = vset.pattern.permute.xlu0 %v7778_v0  ;;  %v3970_v13 = vld [vmem:[#allocation2 + $0x40] sm:$0xff]  ;;  %v3971_v14 = vld [vmem:[#allocation2 + $0x48] sm:$0xff]  ;;  %vm5100_vm13 = vcmp.eq.s32.totalorder %v7883_v16, 0 }
  0x18   :  { %48 = vmax.xlane.f32.xlu0 %v7826_v2  ;;  %33 = vperm.xlu1 %7652, %v28_v3  }
  0x19   :  { %7116 = vmatpush3.bf16.msra.mxu1 %v7779_v1 }
  0x1a   :  { %7117 = vmatprep.subr.bf16.mxu1 %v7779_v1  ;;  %7068 = vmatpush3.bf16.msra.mxu0 %v7779_v1 }
  0x1b   :  { %7069 = vmatprep.subr.bf16.mxu0 %v7779_v1 }
  0x1c   :  { %50 = vmax.xlane.f32.xlu0 %v7834_v4  ;;  %36 = vperm.xlu1 %7652, %v29_v5  }
  0x1d   :  { %7118 = vmatpush3.bf16.msra.mxu1 %v7779_v1 }
  0x1e   :  { %7119 = vmatprep.subr.bf16.mxu1 %v7779_v1  ;;  %7070 = vmatpush3.bf16.msra.mxu0 %v7779_v1 }
  0x1f   :  { %7071 = vmatprep.subr.bf16.mxu0 %v7779_v1 }
  0x20   :  { %1029 = vmax.xlane.f32.xlu0 %v7844_v6 }
  0x21   :  { %7120 = vmatpush3.bf16.msra.mxu1 %v7779_v1 }
  0x22   :  { %7121 = vmatprep.subr.bf16.mxu1 %v7779_v1  ;;  %7072 = vmatpush3.bf16.msra.mxu0 %v7779_v1 }
  0x23   :  { %7073 = vmatprep.subr.bf16.mxu0 %v7779_v1 }
  0x24   :  { %2010 = vmax.xlane.f32.xlu0 %v7871_v9 }
  0x25   :  { %7122 = vmatpush3.bf16.msra.mxu1 %v7779_v1 }
  0x26   :  { %7123 = vmatprep.subr.bf16.mxu1 %v7779_v1  ;;  %7074 = vmatpush3.bf16.msra.mxu0 %v7779_v1 }
  0x27   :  { %7075 = vmatprep.subr.bf16.mxu0 %v7779_v1 }
  0x28   :  { %2012 = vmax.xlane.f32.xlu0 %v7874_v10 }
  0x29   :  { %7124 = vmatpush3.bf16.msra.mxu1 %v7779_v1 }
  0x2a   :  { %7125 = vmatprep.subr.bf16.mxu1 %v7779_v1  ;;  %7076 = vmatpush3.bf16.msra.mxu0 %v7779_v1 }
  0x2b   :  { %7077 = vmatprep.subr.bf16.mxu0 %v7779_v1 }
  0x2c   :  { %2991 = vmax.xlane.f32.xlu0 %v7877_v11 }
  0x2d   :  { %7126 = vmatpush3.bf16.msra.mxu1 %v7779_v1 }
  0x2e   :  { %7127 = vmatprep.subr.bf16.mxu1 %v7779_v1  ;;  %7078 = vmatpush3.bf16.msra.mxu0 %v7779_v1 }
  0x2f   :  { %7079 = vmatprep.subr.bf16.mxu0 %v7779_v1 }
  0x30   :  { %2993 = vmax.xlane.f32.xlu0 %v7880_v12 }
  0x31   :  { %7128 = vmatpush3.bf16.msra.mxu1 %v7779_v1 }
  0x32   :  { %6020 = vmatprep.subr.mxu1 %v7780_v7  ;;  %7080 = vmatpush3.bf16.msra.mxu0 %v7779_v1 }
  0x33   :  { %5900 = vmatprep.subr.mxu0 %v7780_v7 }
  0x34   :  { %3972 = vmax.xlane.f32.xlu0 %v3970_v13 }
  0x38   :  { %3974 = vmax.xlane.f32.xlu0 %v3971_v14 }
  0x40   :  { %1031 = vmax.xlane.f32.xlu1 %v7868_v8 }
  0x97   :  { %v34_v17 = vpop.permute.xlu1 %33 }
  0x98   :  { %vm7886_vm0 = vcmp.eq.s32.totalorder %v7883_v16, %v34_v17 }
  0x99   :  { %v538_v19 = vsel %vm7886_vm0, %v7826_v2, 0.0  ;;  %v1519_v51 = vsel %vm7886_vm0, %v7844_v6, 0.0 }
  0x9a   :  { %v7893_v20 = vand.u32 4294901760, %v538_v19  ;;  %v7995_v52 = vand.u32 4294901760, %v1519_v51 }
  0x9b   :  { %v37_v21 = vpop.permute.xlu1 %36 }
  0x9c   :  { %vm7896_vm1 = vcmp.eq.s32.totalorder %v7883_v16, %v37_v21  ;;  %v606_v23 = vsub.f32 %v538_v19, %v7893_v20  ;;  %v8004_v54 = vsub.f32 %v1519_v51, %v7995_v52 }
  0x9d   :  { %v539_v24 = vsel %vm7896_vm1, %v7834_v4, 0.0  ;;  %v1520_v62 = vsel %vm7896_vm1, %v7868_v8, 0.0 }
  0x9e   :  { %v7904_v25 = vand.u32 4294901760, %v539_v24  ;;  %v607_v26 = vand.u32 4294901760, %v606_v23  ;;  %v1588_v56 = vand.u32 4294901760, %v8004_v54 }
  0xa0   :  { %v7907_v27 = vsub.f32 %v539_v24, %v7904_v25  ;;  %v608_v28 = vsub.f32 %v606_v23, %v607_v26  ;;  %v1589_v58 = vsub.f32 %v8004_v54, %v1588_v56 }
  0xa2   :  { %v609_v29 = vand.u32 4294901760, %v608_v28  ;;  %v617_v30 = vand.u32 4294901760, %v7907_v27  ;;  %v1590_v59 = vand.u32 4294901760, %v1589_v58 }
  0xa4   :  { %6017 = vmatprep.mubr.f32.mxu1 %v609_v29  ;;  %v618_v31 = vsub.f32 %v7907_v27, %v617_v30 }
  0xa5   :  { %v7913_v32 = vpop.xlane.xlu0 %48 }
  0xa6   :  { %v52_v33 = vsub.f32 %v7826_v2, %v7913_v32  ;;  %v619_v34 = vand.u32 4294901760, %v618_v31  ;;  %v8051_v2 = vand.u32 4294901760, %v1520_v62 }
  0xa8   :  { %v54_v35 = vmul.f32 1.442695, %v52_v33  ;;  %6018 = vmatmul.mubr.f32.vlgmr.msra.gmra.mrb[0].mxu1 %v619_v34  ;;  %v8061_v5 = vsub.f32 %v1520_v62, %v8051_v2 }
  0xa9   :  { %v7917_v36 = vpop.xlane.xlu0 %50  ;;  %6021 = vmatpush3.msra.mxu1 %v7780_v7  ;;  %6022 = vmatprep.mubr.f32.mxu1 %v7893_v20 }
  0xaa   :  { %7654 = vpow2.f32 %v54_v35  ;;  %v53_v37 = vsub.f32 %v7834_v4, %v7917_v36  ;;  %6025 = vmatprep.subr.mxu1 %v7780_v7  ;;  %v1598_v14 = vand.u32 4294901760, %v8061_v5 }
  0xac   :  { %v56_v38 = vmul.f32 1.442695, %v53_v37 }
  0xad   :  { %v7998_v53 = vpop.xlane.xlu0 %1029 }
  0xae   :  { %7656 = vpow2.f32 %v56_v38  ;;  %v1033_v55 = vsub.f32 %v7844_v6, %v7998_v53 }
  0xb0   :  { %6023 = vmatmul.mubr.f32.vlgmr.msra.gmra.mrb[0].mxu1 %v7904_v25  ;;  %v1035_v57 = vmul.f32 1.442695, %v1033_v55 }
  0xb1   :  { %6026 = vmatpush3.msra.mxu1 %v7780_v7  ;;  %6027 = vmatprep.mubr.f32.mxu1 %v606_v23  ;;  %v8180_v29 = vpop.xlane.xlu0 %2010 }
  0xb2   :  { %7129 = vmatprep.subr.bf16.mxu1 %v7779_v1  ;;  %7658 = vpow2.f32 %v1035_v57  ;;  %v2014_v31 = vsub.f32 %v7871_v9, %v8180_v29 }
  0xb4   :  { %v7655_v39 = vpop.eup %7654  ;;  %v2016_v34 = vmul.f32 1.442695, %v2014_v31  ;;  %v7715_v31 = vld [vmem:[%s8997_s1] sm:$0xff] }
  0xb5   :  { %v7927_v40 = vand.u32 4294901760, %v7655_v39  ;;  %vm40_vm3 = vcmp.ne.s32.totalorder %v7715_v31, 4294967196 }
  0xb7   :  { %v124_v41 = vsub.f32 %v7655_v39, %v7927_v40  ;;  %v2501_v39 = vsel %vm7896_vm1, %v7874_v10, 0.0 }
  0xb8   :  { %v7657_v42 = vpop.eup %7656  ;;  %6028 = vmatmul.mubr.f32.vlgmr.msra.gmra.mrb[0].mxu1 %v7907_v27  ;;  %v2500_v27 = vsel %vm7886_vm0, %v7871_v9, 0.0 }
  0xb9   :  { %v7931_v43 = vand.u32 4294901760, %v7657_v42  ;;  %7130 = vmatpush3.bf16.msra.mxu1 %v7779_v1  ;;  %v125_v44 = vand.u32 4294901760, %v124_v41  ;;  %6062 = vmatprep.mubr.f32.mxu1 %v607_v26  ;;  %v8177_v28 = vand.u32 4294901760, %v2500_v27 }
  0xba   :  { %7131 = vmatprep.subr.bf16.mxu1 %v7779_v1 }
  0xbb   :  { %v126_v45 = vsub.f32 %v124_v41, %v125_v44  ;;  %v7936_v46 = vsub.f32 %v7657_v42, %v7931_v43 }
  0xbc   :  { %v7659_v60 = vpop.eup %7658 }
  0xbd   :  { %7132 = vmatpush3.bf16.msra.mxu1 %v7779_v1  ;;  %v127_v47 = vand.u32 4294901760, %v126_v45  ;;  %v135_v48 = vand.u32 4294901760, %v7936_v46  ;;  %v8037_v61 = vand.u32 4294901760, %v7659_v60 }
  0xbe   :  { %7133 = vmatprep.subr.bf16.mxu1 %v7779_v1 }
  0xbf   :  { %5897 = vmatprep.mubr.f32.mxu0 %v127_v47  ;;  %v136_v49 = vsub.f32 %v7936_v46, %v135_v48  ;;  %v8047_v63 = vsub.f32 %v7659_v60, %v8037_v61  ;;  %v3481_v60 = vsel %vm7886_vm0, %v7877_v11, 0.0 }
  0xc1   :  { %7134 = vmatpush3.bf16.msra.mxu1 %v7779_v1  ;;  %v137_v50 = vand.u32 4294901760, %v136_v49  ;;  %v1106_v3 = vand.u32 4294901760, %v8047_v63 }
  0xc2   :  { %7135 = vmatprep.subr.bf16.mxu1 %v7779_v1 }
  0xc3   :  { %5898 = vmatmul.mubr.f32.vlgmr.msra.gmra.mrb[0].mxu0 %v137_v50  ;;  %v1107_v13 = vsub.f32 %v8047_v63, %v1106_v3 }
  0xc4   :  { %5901 = vmatpush3.msra.mxu0 %v7780_v7  ;;  %5902 = vmatprep.mubr.f32.mxu0 %v7927_v40 }
  0xc5   :  { %7136 = vmatpush3.bf16.msra.mxu1 %v7779_v1  ;;  %5905 = vmatprep.subr.mxu0 %v7780_v7  ;;  %v1108_v17 = vand.u32 4294901760, %v1107_v13 }
  0xc6   :  { %7137 = vmatprep.subr.bf16.mxu1 %v7779_v1 }
  0xc9   :  { %7138 = vmatpush3.bf16.msra.mxu1 %v7779_v1 }
  0xca   :  { %7139 = vmatprep.subr.bf16.mxu1 %v7779_v1 }
  0xcb   :  { %5903 = vmatmul.mubr.f32.vlgmr.msra.gmra.mrb[0].mxu0 %v7931_v43 }
  0xcc   :  { %5906 = vmatpush3.msra.mxu0 %v7780_v7  ;;  %5907 = vmatprep.mubr.f32.mxu0 %v124_v41  ;;  %v8233_v41 = vand.u32 4294901760, %v2501_v39 }
  0xcd   :  { %7140 = vmatpush3.bf16.msra.mxu1 %v7779_v1  ;;  %7081 = vmatprep.subr.bf16.mxu0 %v7779_v1  ;;  %v8058_v4 = vpop.xlane.xlu1 %1031 }
  0xce   :  { %7141 = vmatprep.subr.bf16.mxu1 %v7779_v1  ;;  %v1034_v6 = vsub.f32 %v7868_v8, %v8058_v4  ;;  %v1599_v8 = vsub.f32 %v8061_v5, %v1598_v14 }
  0xd0   :  { %v1037_v15 = vmul.f32 1.442695, %v1034_v6  ;;  %v1600_v19 = vand.u32 4294901760, %v1599_v8 }
  0xd1   :  { %7142 = vmatpush3.bf16.msra.mxu1 %v7779_v1 }
  0xd2   :  { %7143 = vmatprep.subr.bf16.mxu1 %v7779_v1  ;;  %7660 = vpow2.f32 %v1037_v15 }
  0xd3   :  { %5908 = vmatmul.mubr.f32.vlgmr.msra.gmra.mrb[0].mxu0 %v7936_v46  ;;  %7662 = vpow2.f32 %v2016_v34 }
  0xd4   :  { %7082 = vmatpush3.bf16.msra.mxu0 %v7779_v1  ;;  %5942 = vmatprep.mubr.f32.mxu0 %v125_v44  ;;  %v8243_v44 = vsub.f32 %v2501_v39, %v8233_v41 }
  0xd5   :  { %7144 = vmatpush3.bf16.msra.mxu1 %v7779_v1  ;;  %7083 = vmatprep.subr.bf16.mxu0 %v7779_v1 }
  0xd6   :  { %6065 = vmatprep.subr.mxu1 %v7780_v7  ;;  %v2579_v47 = vand.u32 4294901760, %v8243_v44 }
  0xd8   :  { %7084 = vmatpush3.bf16.msra.mxu0 %v7779_v1  ;;  %6063 = vmatmul.mubr.f32.vlgmr.msra.gmra.mrb[0].mxu1 %v617_v30  ;;  %v8186_v30 = vsub.f32 %v2500_v27, %v8177_v28 }
  0xd9   :  { %6067 = vmatprep.mubr.f32.mxu1 %v7893_v20  ;;  %7085 = vmatprep.subr.bf16.mxu0 %v7779_v1 }
  0xda   :  { %6066 = vmatpush3.msra.mxu1 %v7780_v7  ;;  %v2569_v33 = vand.u32 4294901760, %v8186_v30 }
  0xdb   :  { %7145 = vmatprep.subr.bf16.mxu1 %v7779_v1 }
  0xdc   :  { %7086 = vmatpush3.bf16.msra.mxu0 %v7779_v1  ;;  %v2570_v9 = vsub.f32 %v8186_v30, %v2569_v33 }
  0xdd   :  { %7087 = vmatprep.subr.bf16.mxu0 %v7779_v1 }
  0xde   :  { %v2571_v35 = vand.u32 4294901760, %v2570_v9 }
  0xe0   :  { %7088 = vmatpush3.bf16.msra.mxu0 %v7779_v1  ;;  %6068 = vmatmul.mubr.f32.vlgmr.msra.gmra.mrb[0].mxu1 %v7904_v25 }
  0xe1   :  { %7146 = vmatpush3.bf16.msra.mxu1 %v7779_v1  ;;  %6102 = vmatprep.mubr.f32.mxu1 %v7893_v20  ;;  %v7661_v20 = vpop.eup %7660 }
  0xe2   :  { %7089 = vmatprep.subr.bf16.mxu0 %v7779_v1  ;;  %7147 = vmatprep.subr.bf16.mxu1 %v7779_v1  ;;  %v8095_v21 = vand.u32 4294901760, %v7661_v20  ;;  %v7663_v37 = vpop.eup %7662 }
  0xe3   :  { %v8219_v38 = vand.u32 4294901760, %v7663_v37 }
  0xe4   :  { %7090 = vmatpush3.bf16.msra.mxu0 %v7779_v1  ;;  %v8104_v23 = vsub.f32 %v7661_v20, %v8095_v21 }
  0xe5   :  { %7148 = vmatpush3.bf16.msra.mxu1 %v7779_v1  ;;  %7091 = vmatprep.subr.bf16.mxu0 %v7779_v1 }
  0xe6   :  { %7149 = vmatprep.subr.bf16.mxu1 %v7779_v1  ;;  %v1116_v24 = vand.u32 4294901760, %v8104_v23 }
  0xe8   :  { %7092 = vmatpush3.bf16.msra.mxu0 %v7779_v1 }
  0xe9   :  { %7150 = vmatpush3.bf16.msra.mxu1 %v7779_v1  ;;  %7093 = vmatprep.subr.bf16.mxu0 %v7779_v1 }
  0xea   :  { %7151 = vmatprep.subr.bf16.mxu1 %v7779_v1 }
  0xec   :  { %7094 = vmatpush3.bf16.msra.mxu0 %v7779_v1 }
  0xed   :  { %7152 = vmatpush3.bf16.msra.mxu1 %v7779_v1  ;;  %7095 = vmatprep.subr.bf16.mxu0 %v7779_v1 }
  0xee   :  { %7153 = vmatprep.subr.bf16.mxu1 %v7779_v1 }
  0xf0   :  { %7096 = vmatpush3.bf16.msra.mxu0 %v7779_v1 }
  0xf1   :  { %7154 = vmatpush3.bf16.msra.mxu1 %v7779_v1  ;;  %5945 = vmatprep.subr.mxu0 %v7780_v7 }
  0xf2   :  { %7155 = vmatprep.subr.bf16.mxu1 %v7779_v1 }
  0xf3   :  { %5943 = vmatmul.mubr.f32.vlgmr.msra.gmra.mrb[0].mxu0 %v135_v48 }
  0xf4   :  { %5946 = vmatpush3.msra.mxu0 %v7780_v7  ;;  %5947 = vmatprep.mubr.f32.mxu0 %v7927_v40 }
  0xf5   :  { %7156 = vmatpush3.bf16.msra.mxu1 %v7779_v1  ;;  %7097 = vmatprep.subr.bf16.mxu0 %v7779_v1 }
  0xf6   :  { %7157 = vmatprep.subr.bf16.mxu1 %v7779_v1 }
  0xf9   :  { %7158 = vmatpush3.bf16.msra.mxu1 %v7779_v1 }
  0xfa   :  { %7159 = vmatprep.subr.bf16.mxu1 %v7779_v1 }
  0xfb   :  { %5948 = vmatmul.mubr.f32.vlgmr.msra.gmra.mrb[0].mxu0 %v7931_v43 }
  0xfc   :  { %7098 = vmatpush3.bf16.msra.mxu0 %v7779_v1  ;;  %5982 = vmatprep.mubr.f32.mxu0 %v7927_v40  ;;  %v8229_v40 = vsub.f32 %v7663_v37, %v8219_v38 }
  0xfd   :  { %7160 = vmatpush3.bf16.msra.mxu1 %v7779_v1  ;;  %7099 = vmatprep.subr.bf16.mxu0 %v7779_v1 }
  0xfe   :  { %7209 = vmatprep.subr.bf16.mxu1 %v7779_v1  ;;  %v2087_v42 = vand.u32 4294901760, %v8229_v40 }
 0x100   :  { %7100 = vmatpush3.bf16.msra.mxu0 %v7779_v1  ;;  %6103 = vmatmul.mubr.f32.vlgmr.msra.gmra.mrb[0].mxu1 %v7904_v25  ;;  %v1117_v25 = vsub.f32 %v8104_v23, %v1116_v24  ;;  %v2088_v46 = vsub.f32 %v8229_v40, %v2087_v42 }
 0x101   :  { %7210 = vmatpush3.bf16.msra.mxu1 %v7779_v1  ;;  %6257 = vmatprep.mubr.f32.mxu1 %v1590_v59 }
 0x102   :  { %7101 = vmatprep.subr.bf16.mxu0 %v7779_v1  ;;  %7211 = vmatprep.subr.bf16.mxu1 %v7779_v1  ;;  %v1118_v26 = vand.u32 4294901760, %v1117_v25  ;;  %v2089_v49 = vand.u32 4294901760, %v2088_v46 }
 0x104   :  { %7102 = vmatpush3.bf16.msra.mxu0 %v7779_v1 }
 0x105   :  { %7212 = vmatpush3.bf16.msra.mxu1 %v7779_v1  ;;  %7103 = vmatprep.subr.bf16.mxu0 %v7779_v1 }
 0x106   :  { %7213 = vmatprep.subr.bf16.mxu1 %v7779_v1 }
 0x108   :  { %7104 = vmatpush3.bf16.msra.mxu0 %v7779_v1 }
 0x109   :  { %7214 = vmatpush3.bf16.msra.mxu1 %v7779_v1  ;;  %7105 = vmatprep.subr.bf16.mxu0 %v7779_v1 }
 0x10a   :  { %7215 = vmatprep.subr.bf16.mxu1 %v7779_v1 }
 0x10c   :  { %7106 = vmatpush3.bf16.msra.mxu0 %v7779_v1 }
 0x10d   :  { %7216 = vmatpush3.bf16.msra.mxu1 %v7779_v1  ;;  %7107 = vmatprep.subr.bf16.mxu0 %v7779_v1 }
 0x10e   :  { %7217 = vmatprep.subr.bf16.mxu1 %v7779_v1 }
 0x110   :  { %7108 = vmatpush3.bf16.msra.mxu0 %v7779_v1 }
 0x111   :  { %7218 = vmatpush3.bf16.msra.mxu1 %v7779_v1  ;;  %7109 = vmatprep.subr.bf16.mxu0 %v7779_v1 }
 0x112   :  { %7219 = vmatprep.subr.bf16.mxu1 %v7779_v1 }
 0x114   :  { %7110 = vmatpush3.bf16.msra.mxu0 %v7779_v1 }
 0x115   :  { %7220 = vmatpush3.bf16.msra.mxu1 %v7779_v1  ;;  %7111 = vmatprep.subr.bf16.mxu0 %v7779_v1 }
 0x116   :  { %7221 = vmatprep.subr.bf16.mxu1 %v7779_v1 }
 0x118   :  { %7112 = vmatpush3.bf16.msra.mxu0 %v7779_v1 }
 0x119   :  { %7222 = vmatpush3.bf16.msra.mxu1 %v7779_v1  ;;  %7161 = vmatprep.subr.bf16.mxu0 %v7779_v1 }
 0x11a   :  { %7223 = vmatprep.subr.bf16.mxu1 %v7779_v1 }
 0x11b   :  { %5983 = vmatmul.mubr.f32.vlgmr.msra.gmra.mrb[0].mxu0 %v7931_v43  ;;  %v8240_v43 = vpop.xlane.xlu0 %2012 }
 0x11c   :  { %7162 = vmatpush3.bf16.msra.mxu0 %v7779_v1  ;;  %6137 = vmatprep.mubr.f32.mxu0 %v1108_v17  ;;  %v2015_v45 = vsub.f32 %v7874_v10, %v8240_v43  ;;  %v2580_v10 = vsub.f32 %v8243_v44, %v2579_v47 }
 0x11d   :  { %7224 = vmatpush3.bf16.msra.mxu1 %v7779_v1  ;;  %7163 = vmatprep.subr.bf16.mxu0 %v7779_v1 }
 0x11e   :  { %6260 = vmatprep.subr.mxu1 %v7780_v7  ;;  %v2018_v48 = vmul.f32 1.442695, %v2015_v45  ;;  %v2581_v50 = vand.u32 4294901760, %v2580_v10  ;;  %v7716_v10 = vld [vmem:[#allocation2 + $0x38] sm:$0xff] }
 0x11f   :  { %v8366_v62 = vpop.xlane.xlu0 %2991 }
 0x120   :  { %7164 = vmatpush3.bf16.msra.mxu0 %v7779_v1  ;;  %6258 = vmatmul.mubr.f32.vlgmr.msra.gmra.mrb[2].mxu1 %v1600_v19  ;;  %7664 = vpow2.f32 %v2018_v48 }
 0x121   :  { %6262 = vmatprep.mubr.f32.mxu1 %v7995_v52  ;;  %7165 = vmatprep.subr.bf16.mxu0 %v7779_v1 }
 0x122   :  { %6261 = vmatpush3.msra.mxu1 %v7780_v7 }
 0x123   :  { %6265 = vmatprep.subr.mxu1 %v7780_v7 }
 0x124   :  { %7166 = vmatpush3.bf16.msra.mxu0 %v7779_v1 }
 0x125   :  { %7167 = vmatprep.subr.bf16.mxu0 %v7779_v1 }
 0x128   :  { %7168 = vmatpush3.bf16.msra.mxu0 %v7779_v1  ;;  %6263 = vmatmul.mubr.f32.vlgmr.msra.gmra.mrb[2].mxu1 %v8051_v2 }
 0x129   :  { %6267 = vmatprep.mubr.f32.mxu1 %v8004_v54  ;;  %7169 = vmatprep.subr.bf16.mxu0 %v7779_v1 }
 0x12a   :  { %6266 = vmatpush3.msra.mxu1 %v7780_v7  ;;  %v7665_v51 = vpop.eup %7664 }
 0x12b   :  { %7225 = vmatprep.subr.bf16.mxu1 %v7779_v1 }
 0x12c   :  { %7170 = vmatpush3.bf16.msra.mxu0 %v7779_v1 }
 0x12d   :  { %7171 = vmatprep.subr.bf16.mxu0 %v7779_v1 }
 0x130   :  { %7172 = vmatpush3.bf16.msra.mxu0 %v7779_v1  ;;  %6268 = vmatmul.mubr.f32.vlgmr.msra.gmra.mrb[2].mxu1 %v8061_v5 }
 0x131   :  { %7226 = vmatpush3.bf16.msra.mxu1 %v7779_v1  ;;  %6302 = vmatprep.mubr.f32.mxu1 %v1588_v56 }
 0x132   :  { %7173 = vmatprep.subr.bf16.mxu0 %v7779_v1  ;;  %7227 = vmatprep.subr.bf16.mxu1 %v7779_v1 }
 0x134   :  { %7174 = vmatpush3.bf16.msra.mxu0 %v7779_v1 }
 0x135   :  { %7228 = vmatpush3.bf16.msra.mxu1 %v7779_v1  ;;  %7175 = vmatprep.subr.bf16.mxu0 %v7779_v1 }
 0x136   :  { %7229 = vmatprep.subr.bf16.mxu1 %v7779_v1 }
 0x138   :  { %7176 = vmatpush3.bf16.msra.mxu0 %v7779_v1 }
 0x139   :  { %7230 = vmatpush3.bf16.msra.mxu1 %v7779_v1  ;;  %6140 = vmatprep.subr.mxu0 %v7780_v7 }
 0x13a   :  { %7231 = vmatprep.subr.bf16.mxu1 %v7779_v1 }
 0x13b   :  { %6138 = vmatmul.mubr.f32.vlgmr.msra.gmra.mrb[2].mxu0 %v1118_v26 }
 0x13c   :  { %6141 = vmatpush3.msra.mxu0 %v7780_v7  ;;  %6142 = vmatprep.mubr.f32.mxu0 %v8037_v61 }
 0x13d   :  { %7232 = vmatpush3.bf16.msra.mxu1 %v7779_v1  ;;  %6145 = vmatprep.subr.mxu0 %v7780_v7 }
 0x13e   :  { %7233 = vmatprep.subr.bf16.mxu1 %v7779_v1 }
 0x141   :  { %7234 = vmatpush3.bf16.msra.mxu1 %v7779_v1 }
 0x142   :  { %7235 = vmatprep.subr.bf16.mxu1 %v7779_v1 }
 0x143   :  { %6143 = vmatmul.mubr.f32.vlgmr.msra.gmra.mrb[2].mxu0 %v8095_v21 }
 0x144   :  { %6146 = vmatpush3.msra.mxu0 %v7780_v7  ;;  %6147 = vmatprep.mubr.f32.mxu0 %v8047_v63 }
 0x145   :  { %7236 = vmatpush3.bf16.msra.mxu1 %v7779_v1  ;;  %7177 = vmatprep.subr.bf16.mxu0 %v7779_v1 }
 0x146   :  { %7237 = vmatprep.subr.bf16.mxu1 %v7779_v1 }
 0x149   :  { %7238 = vmatpush3.bf16.msra.mxu1 %v7779_v1 }
 0x14a   :  { %7239 = vmatprep.subr.bf16.mxu1 %v7779_v1 }
 0x14b   :  { %6148 = vmatmul.mubr.f32.vlgmr.msra.gmra.mrb[2].mxu0 %v8104_v23  ;;  %v7714_v23 = vld [vmem:[%s8997_s1 + $0x8] sm:$0xff]  ;;  %s7781_s1 = smov [#allocation5]  }
 0x14c   :  { %7178 = vmatpush3.bf16.msra.mxu0 %v7779_v1  ;;  %6182 = vmatprep.mubr.f32.mxu0 %v1106_v3  ;;  %vm41_vm2 = vcmp.ne.s32.totalorder %v7714_v23, 4294967196  ;;  %s5199_s6 = sshll.u32 %s7781_s1, 4  ;;  %s5200_s6 = int_to_ptr.vmem [resolvable:$true] %s5199_s6 }
 0x14d   :  { %7240 = vmatpush3.bf16.msra.mxu1 %v7779_v1  ;;  %7179 = vmatprep.subr.bf16.mxu0 %v7779_v1  ;;  %v8433_v34 = vsel %vm41_vm2, 1.0, %v7780_v7  ;;  %s7749_s7 = scalar_lea.vmem %s5200_s6, 256  ;;  %p7754_p9 = scmp.lt.s32.totalorder %s5200_s6, %s5200_s6 }
 0x14e   :  { %6305 = vmatprep.subr.mxu1 %v7780_v7  ;;  %p7750_p8 = scmp.ne.s32.totalorder %s5200_s6, %s7749_s7  ;;  %p7755_p10 = scmp.lt.s32.totalorder %s7749_s7, %s7749_s7 }
 0x150   :  { %7180 = vmatpush3.bf16.msra.mxu0 %v7779_v1  ;;  %6303 = vmatmul.mubr.f32.vlgmr.msra.gmra.mrb[2].mxu1 %v1598_v14  ;;  %p7756_p11 = por %p7755_p10, %p7754_p9 }
 0x151   :  { %6307 = vmatprep.mubr.f32.mxu1 %v7995_v52  ;;  %7181 = vmatprep.subr.bf16.mxu0 %v7779_v1 }
 0x152   :  { %6306 = vmatpush3.msra.mxu1 %v7780_v7  ;;  %p7757_p12 = pnand %p7756_p11, %p7750_p8 }
 0x153   :  { %7241 = vmatprep.subr.bf16.mxu1 %v7779_v1 }
 0x154   :  { %7182 = vmatpush3.bf16.msra.mxu0 %v7779_v1 }
 0x155   :  { %7183 = vmatprep.subr.bf16.mxu0 %v7779_v1 }
 0x158   :  { %7184 = vmatpush3.bf16.msra.mxu0 %v7779_v1  ;;  %6308 = vmatmul.mubr.f32.vlgmr.msra.gmra.mrb[2].mxu1 %v8051_v2 }
 0x159   :  { %7242 = vmatpush3.bf16.msra.mxu1 %v7779_v1  ;;  %6342 = vmatprep.mubr.f32.mxu1 %v7995_v52  ;;  %v8277_v52 = vand.u32 4294901760, %v7665_v51 }
 0x15a   :  { %7185 = vmatprep.subr.bf16.mxu0 %v7779_v1  ;;  %7243 = vmatprep.subr.bf16.mxu1 %v7779_v1 }
 0x15b   :  { %v8286_v54 = vsub.f32 %v7665_v51, %v8277_v52 }
 0x15c   :  { %7186 = vmatpush3.bf16.msra.mxu0 %v7779_v1 }
 0x15d   :  { %7244 = vmatpush3.bf16.msra.mxu1 %v7779_v1  ;;  %7187 = vmatprep.subr.bf16.mxu0 %v7779_v1  ;;  %v2097_v55 = vand.u32 4294901760, %v8286_v54 }
 0x15e   :  { %7245 = vmatprep.subr.bf16.mxu1 %v7779_v1 }
 0x15f   :  { %v2098_v56 = vsub.f32 %v8286_v54, %v2097_v55 }
 0x160   :  { %7188 = vmatpush3.bf16.msra.mxu0 %v7779_v1 }
 0x161   :  { %7246 = vmatpush3.bf16.msra.mxu1 %v7779_v1  ;;  %7189 = vmatprep.subr.bf16.mxu0 %v7779_v1  ;;  %v2099_v57 = vand.u32 4294901760, %v2098_v56 }
 0x162   :  { %7247 = vmatprep.subr.bf16.mxu1 %v7779_v1 }
 0x164   :  { %7190 = vmatpush3.bf16.msra.mxu0 %v7779_v1 }
 0x165   :  { %7248 = vmatpush3.bf16.msra.mxu1 %v7779_v1  ;;  %7191 = vmatprep.subr.bf16.mxu0 %v7779_v1 }
 0x166   :  { %7249 = vmatprep.subr.bf16.mxu1 %v7779_v1 }
 0x168   :  { %7192 = vmatpush3.bf16.msra.mxu0 %v7779_v1 }
 0x169   :  { %7250 = vmatpush3.bf16.msra.mxu1 %v7779_v1  ;;  %6185 = vmatprep.subr.mxu0 %v7780_v7 }
 0x16a   :  { %7251 = vmatprep.subr.bf16.mxu1 %v7779_v1 }
 0x16b   :  { %6183 = vmatmul.mubr.f32.vlgmr.msra.gmra.mrb[2].mxu0 %v1116_v24  ;;  %v3482_v24 = vsel %vm7896_vm1, %v7880_v12, 0.0 }
 0x16c   :  { %6186 = vmatpush3.msra.mxu0 %v7780_v7  ;;  %6187 = vmatprep.mubr.f32.mxu0 %v8037_v61  ;;  %v8435_v9 = vand.u32 4294901760, %v3482_v24 }
 0x16d   :  { %7252 = vmatpush3.bf16.msra.mxu1 %v7779_v1  ;;  %7193 = vmatprep.subr.bf16.mxu0 %v7779_v1 }
 0x16e   :  { %7253 = vmatprep.subr.bf16.mxu1 %v7779_v1  ;;  %v8460_v45 = vsub.f32 %v3482_v24, %v8435_v9 }
 0x170   :  { %v3560_v56 = vand.u32 4294901760, %v8460_v45 }
 0x171   :  { %7254 = vmatpush3.bf16.msra.mxu1 %v7779_v1 }
 0x172   :  { %7255 = vmatprep.subr.bf16.mxu1 %v7779_v1 }
 0x173   :  { %6188 = vmatmul.mubr.f32.vlgmr.msra.gmra.mrb[2].mxu0 %v8095_v21 }
 0x174   :  { %7194 = vmatpush3.bf16.msra.mxu0 %v7779_v1  ;;  %6222 = vmatprep.mubr.f32.mxu0 %v8037_v61  ;;  %v8363_v61 = vand.u32 4294901760, %v3481_v60 }
 0x175   :  { %7256 = vmatpush3.bf16.msra.mxu1 %v7779_v1  ;;  %7195 = vmatprep.subr.bf16.mxu0 %v7779_v1 }
 0x176   :  { %7305 = vmatprep.subr.bf16.mxu1 %v7779_v1  ;;  %v8372_v63 = vsub.f32 %v3481_v60, %v8363_v61 }
 0x178   :  { %7196 = vmatpush3.bf16.msra.mxu0 %v7779_v1  ;;  %6343 = vmatmul.mubr.f32.vlgmr.msra.gmra.mrb[2].mxu1 %v8051_v2  ;;  %v2995_v2 = vsub.f32 %v7877_v11, %v8366_v62  ;;  %v3550_v3 = vand.u32 4294901760, %v8372_v63 }
 0x179   :  { %7306 = vmatpush3.bf16.msra.mxu1 %v7779_v1  ;;  %6497 = vmatprep.mubr.f32.mxu1 %v2571_v35 }
 0x17a   :  { %7197 = vmatprep.subr.bf16.mxu0 %v7779_v1  ;;  %7307 = vmatprep.subr.bf16.mxu1 %v7779_v1  ;;  %v2997_v5 = vmul.f32 1.442695, %v2995_v2  ;;  %v3551_v11 = vsub.f32 %v8372_v63, %v3550_v3 }
 0x17c   :  { %7198 = vmatpush3.bf16.msra.mxu0 %v7779_v1  ;;  %7666 = vpow2.f32 %v2997_v5  ;;  %v3552_v13 = vand.u32 4294901760, %v3551_v11 }
 0x17d   :  { %7308 = vmatpush3.bf16.msra.mxu1 %v7779_v1  ;;  %7199 = vmatprep.subr.bf16.mxu0 %v7779_v1 }
 0x17e   :  { %7309 = vmatprep.subr.bf16.mxu1 %v7779_v1 }
 0x180   :  { %7200 = vmatpush3.bf16.msra.mxu0 %v7779_v1 }
 0x181   :  { %7310 = vmatpush3.bf16.msra.mxu1 %v7779_v1  ;;  %7201 = vmatprep.subr.bf16.mxu0 %v7779_v1 }
 0x182   :  { %7311 = vmatprep.subr.bf16.mxu1 %v7779_v1 }
 0x184   :  { %7202 = vmatpush3.bf16.msra.mxu0 %v7779_v1 }
 0x185   :  { %7312 = vmatpush3.bf16.msra.mxu1 %v7779_v1  ;;  %7203 = vmatprep.subr.bf16.mxu0 %v7779_v1 }
 0x186   :  { %7313 = vmatprep.subr.bf16.mxu1 %v7779_v1  ;;  %v7667_v15 = vpop.eup %7666 }
 0x187   :  { %v8405_v17 = vand.u32 4294901760, %v7667_v15 }
 0x188   :  { %7204 = vmatpush3.bf16.msra.mxu0 %v7779_v1 }
 0x189   :  { %7314 = vmatpush3.bf16.msra.mxu1 %v7779_v1  ;;  %7205 = vmatprep.subr.bf16.mxu0 %v7779_v1 }
 0x18a   :  { %7315 = vmatprep.subr.bf16.mxu1 %v7779_v1 }
 0x18c   :  { %7206 = vmatpush3.bf16.msra.mxu0 %v7779_v1 }
 0x18d   :  { %7316 = vmatpush3.bf16.msra.mxu1 %v7779_v1  ;;  %7207 = vmatprep.subr.bf16.mxu0 %v7779_v1 }
 0x18e   :  { %7317 = vmatprep.subr.bf16.mxu1 %v7779_v1 }
 0x190   :  { %7208 = vmatpush3.bf16.msra.mxu0 %v7779_v1 }
 0x191   :  { %7318 = vmatpush3.bf16.msra.mxu1 %v7779_v1  ;;  %7257 = vmatprep.subr.bf16.mxu0 %v7779_v1 }
 0x192   :  { %7319 = vmatprep.subr.bf16.mxu1 %v7779_v1 }
 0x193   :  { %6223 = vmatmul.mubr.f32.vlgmr.msra.gmra.mrb[2].mxu0 %v8095_v21 }
 0x194   :  { %7258 = vmatpush3.bf16.msra.mxu0 %v7779_v1  ;;  %6377 = vmatprep.mubr.f32.mxu0 %v2089_v49 }
 0x195   :  { %7320 = vmatpush3.bf16.msra.mxu1 %v7779_v1  ;;  %7259 = vmatprep.subr.bf16.mxu0 %v7779_v1 }
 0x196   :  { %6500 = vmatprep.subr.mxu1 %v7780_v7 }
 0x198   :  { %7260 = vmatpush3.bf16.msra.mxu0 %v7779_v1  ;;  %6498 = vmatmul.mubr.f32.vlgmr.msra.gmra.mrb[4].mxu1 %v2581_v50 }
 0x199   :  { %6502 = vmatprep.mubr.f32.mxu1 %v8177_v28  ;;  %7261 = vmatprep.subr.bf16.mxu0 %v7779_v1 }
 0x19a   :  { %6501 = vmatpush3.msra.mxu1 %v7780_v7 }
 0x19b   :  { %6505 = vmatprep.subr.mxu1 %v7780_v7 }
 0x19c   :  { %7262 = vmatpush3.bf16.msra.mxu0 %v7779_v1 }
 0x19d   :  { %7263 = vmatprep.subr.bf16.mxu0 %v7779_v1 }
 0x1a0   :  { %7264 = vmatpush3.bf16.msra.mxu0 %v7779_v1  ;;  %6503 = vmatmul.mubr.f32.vlgmr.msra.gmra.mrb[4].mxu1 %v8233_v41 }
 0x1a1   :  { %6507 = vmatprep.mubr.f32.mxu1 %v8186_v30  ;;  %7265 = vmatprep.subr.bf16.mxu0 %v7779_v1  ;;  %v8424_v30 = vsub.f32 %v7667_v15, %v8405_v17 }
 0x1a2   :  { %6506 = vmatpush3.msra.mxu1 %v7780_v7 }
 0x1a3   :  { %7321 = vmatprep.subr.bf16.mxu1 %v7779_v1 }
 0x1a4   :  { %7266 = vmatpush3.bf16.msra.mxu0 %v7779_v1 }
 0x1a5   :  { %7267 = vmatprep.subr.bf16.mxu0 %v7779_v1 }
 0x1a8   :  { %7268 = vmatpush3.bf16.msra.mxu0 %v7779_v1  ;;  %6508 = vmatmul.mubr.f32.vlgmr.msra.gmra.mrb[4].mxu1 %v8243_v44  ;;  %v8457_v44 = vpop.xlane.xlu0 %2993 }
 0x1a9   :  { %7322 = vmatpush3.bf16.msra.mxu1 %v7779_v1  ;;  %6542 = vmatprep.mubr.f32.mxu1 %v2569_v33  ;;  %v2996_v50 = vsub.f32 %v7716_v10, %v8457_v44 }
 0x1aa   :  { %7269 = vmatprep.subr.bf16.mxu0 %v7779_v1  ;;  %7323 = vmatprep.subr.bf16.mxu1 %v7779_v1 }
 0x1ac   :  { %7270 = vmatpush3.bf16.msra.mxu0 %v7779_v1  ;;  %v8604_v18 = vpop.xlane.xlu0 %3972 }
 0x1ad   :  { %7324 = vmatpush3.bf16.msra.mxu1 %v7779_v1  ;;  %7271 = vmatprep.subr.bf16.mxu0 %v7779_v1 }
 0x1ae   :  { %7325 = vmatprep.subr.bf16.mxu1 %v7779_v1 }
 0x1b0   :  { %7272 = vmatpush3.bf16.msra.mxu0 %v7779_v1 }
 0x1b1   :  { %7326 = vmatpush3.bf16.msra.mxu1 %v7779_v1  ;;  %6380 = vmatprep.subr.mxu0 %v7780_v7 }
 0x1b2   :  { %7327 = vmatprep.subr.bf16.mxu1 %v7779_v1 }
 0x1b3   :  { %6378 = vmatmul.mubr.f32.vlgmr.msra.gmra.mrb[4].mxu0 %v2099_v57  ;;  %v2999_v57 = vmul.f32 1.442695, %v2996_v50 }
 0x1b4   :  { %6381 = vmatpush3.msra.mxu0 %v7780_v7  ;;  %6382 = vmatprep.mubr.f32.mxu0 %v8219_v38 }
 0x1b5   :  { %7328 = vmatpush3.bf16.msra.mxu1 %v7779_v1  ;;  %6385 = vmatprep.subr.mxu0 %v7780_v7 }
 0x1b6   :  { %7329 = vmatprep.subr.bf16.mxu1 %v7779_v1 }
 0x1b9   :  { %7330 = vmatpush3.bf16.msra.mxu1 %v7779_v1 }
 0x1ba   :  { %7331 = vmatprep.subr.bf16.mxu1 %v7779_v1 }
 0x1bb   :  { %6383 = vmatmul.mubr.f32.vlgmr.msra.gmra.mrb[4].mxu0 %v8277_v52 }
 0x1bc   :  { %6386 = vmatpush3.msra.mxu0 %v7780_v7  ;;  %6387 = vmatprep.mubr.f32.mxu0 %v8229_v40  ;;  %v8449_v40 = vsel %vm40_vm3, 1.0, %v7780_v7  ;;  %vm5113_vm3 = vcmp.eq.s32.totalorder %v7883_v16, 1 }
 0x1bd   :  { %7332 = vmatpush3.bf16.msra.mxu1 %v7779_v1  ;;  %7273 = vmatprep.subr.bf16.mxu0 %v7779_v1 }
 0x1be   :  { %7333 = vmatprep.subr.bf16.mxu1 %v7779_v1 }
 0x1c1   :  { %7334 = vmatpush3.bf16.msra.mxu1 %v7779_v1 }
 0x1c2   :  { %7335 = vmatprep.subr.bf16.mxu1 %v7779_v1 }
 0x1c3   :  { %6388 = vmatmul.mubr.f32.vlgmr.msra.gmra.mrb[4].mxu0 %v8286_v54 }
 0x1c4   :  { %7274 = vmatpush3.bf16.msra.mxu0 %v7779_v1  ;;  %6422 = vmatprep.mubr.f32.mxu0 %v2087_v42 }
 0x1c5   :  { %7336 = vmatpush3.bf16.msra.mxu1 %v7779_v1  ;;  %7275 = vmatprep.subr.bf16.mxu0 %v7779_v1 }
 0x1c6   :  { %6545 = vmatprep.subr.mxu1 %v7780_v7 }
 0x1c8   :  { %7276 = vmatpush3.bf16.msra.mxu0 %v7779_v1  ;;  %6543 = vmatmul.mubr.f32.vlgmr.msra.gmra.mrb[4].mxu1 %v2579_v47 }
 0x1c9   :  { %6547 = vmatprep.mubr.f32.mxu1 %v8177_v28  ;;  %7277 = vmatprep.subr.bf16.mxu0 %v7779_v1 }
 0x1ca   :  { %6546 = vmatpush3.msra.mxu1 %v7780_v7 }
 0x1cb   :  { %7337 = vmatprep.subr.bf16.mxu1 %v7779_v1 }
 0x1cc   :  { %7278 = vmatpush3.bf16.msra.mxu0 %v7779_v1 }
 0x1cd   :  { %7279 = vmatprep.subr.bf16.mxu0 %v7779_v1 }
 0x1d0   :  { %7280 = vmatpush3.bf16.msra.mxu0 %v7779_v1  ;;  %6548 = vmatmul.mubr.f32.vlgmr.msra.gmra.mrb[4].mxu1 %v8233_v41 }
 0x1d1   :  { %7338 = vmatpush3.bf16.msra.mxu1 %v7779_v1  ;;  %6582 = vmatprep.mubr.f32.mxu1 %v8177_v28 }
 0x1d2   :  { %7281 = vmatprep.subr.bf16.mxu0 %v7779_v1  ;;  %7339 = vmatprep.subr.bf16.mxu1 %v7779_v1 }
 0x1d3   :  { %v8344_v58 = vpop.f32.mrb[0].mxu1 }
 0x1d4   :  { %7282 = vmatpush3.bf16.msra.mxu0 %v7779_v1  ;;  %v8347_v59 = vpop.f32.mrb[1].mxu1 }
 0x1d5   :  { %7340 = vmatpush3.bf16.msra.mxu1 %v7779_v1  ;;  %7283 = vmatprep.subr.bf16.mxu0 %v7779_v1 }
 0x1d6   :  { %7341 = vmatprep.subr.bf16.mxu1 %v7779_v1 }
 0x1d8   :  { %7284 = vmatpush3.bf16.msra.mxu0 %v7779_v1 }
 0x1d9   :  { %7342 = vmatpush3.bf16.msra.mxu1 %v7779_v1  ;;  %7285 = vmatprep.subr.bf16.mxu0 %v7779_v1 }
 0x1da   :  { %7343 = vmatprep.subr.bf16.mxu1 %v7779_v1 }
 0x1dc   :  { %7286 = vmatpush3.bf16.msra.mxu0 %v7779_v1 }
 0x1dd   :  { %7344 = vmatpush3.bf16.msra.mxu1 %v7779_v1  ;;  %7287 = vmatprep.subr.bf16.mxu0 %v7779_v1 }
 0x1de   :  { %7345 = vmatprep.subr.bf16.mxu1 %v7779_v1 }
 0x1e0   :  { %7288 = vmatpush3.bf16.msra.mxu0 %v7779_v1 }
 0x1e1   :  { %7346 = vmatpush3.bf16.msra.mxu1 %v7779_v1  ;;  %6425 = vmatprep.subr.mxu0 %v7780_v7 }
 0x1e2   :  { %7347 = vmatprep.subr.bf16.mxu1 %v7779_v1 }
 0x1e3   :  { %6423 = vmatmul.mubr.f32.vlgmr.msra.gmra.mrb[4].mxu0 %v2097_v55 }
 0x1e4   :  { %6426 = vmatpush3.msra.mxu0 %v7780_v7  ;;  %6427 = vmatprep.mubr.f32.mxu0 %v8219_v38 }
 0x1e5   :  { %7348 = vmatpush3.bf16.msra.mxu1 %v7779_v1  ;;  %7289 = vmatprep.subr.bf16.mxu0 %v7779_v1 }
 0x1e6   :  { %7349 = vmatprep.subr.bf16.mxu1 %v7779_v1 }
 0x1e9   :  { %7350 = vmatpush3.bf16.msra.mxu1 %v7779_v1 }
 0x1ea   :  { %7351 = vmatprep.subr.bf16.mxu1 %v7779_v1 }
 0x1eb   :  { %6428 = vmatmul.mubr.f32.vlgmr.msra.gmra.mrb[4].mxu0 %v8277_v52 }
 0x1ec   :  { %7290 = vmatpush3.bf16.msra.mxu0 %v7779_v1  ;;  %6462 = vmatprep.mubr.f32.mxu0 %v8219_v38 }
 0x1ed   :  { %7352 = vmatpush3.bf16.msra.mxu1 %v7779_v1  ;;  %7291 = vmatprep.subr.bf16.mxu0 %v7779_v1 }
 0x1ee   :  { %7401 = vmatprep.subr.bf16.mxu1 %v7779_v1  ;;  %v5984_v6 = vpop.f32.mrb[0].mxu0 }
 0x1ef   :  { %7668 = vrcp.f32 %v5984_v6  ;;  %v524_v14 = vpop.f32.mrb[1].mxu0 }
 0x1f0   :  { %7292 = vmatpush3.bf16.msra.mxu0 %v7779_v1  ;;  %6583 = vmatmul.mubr.f32.vlgmr.msra.gmra.mrb[4].mxu1 %v8233_v41  ;;  %7670 = vlog2.f32 %v5984_v6  ;;  %v3068_v41 = vand.u32 4294901760, %v8424_v30 }
 0x1f1   :  { %7402 = vmatpush3.bf16.msra.mxu1 %v7779_v1  ;;  %6737 = vmatprep.mubr.f32.mxu1 %v3552_v13  ;;  %7672 = vrcp.f32 %v524_v14 }
 0x1f2   :  { %7674 = vlog2.f32 %v524_v14  ;;  %7293 = vmatprep.subr.bf16.mxu0 %v7779_v1  ;;  %7403 = vmatprep.subr.bf16.mxu1 %v7779_v1  ;;  %v3069_v51 = vsub.f32 %v8424_v30, %v3068_v41 }
 0x1f3   :  { %7676 = vpow2.f32 %v2999_v57 }
 0x1f4   :  { %7294 = vmatpush3.bf16.msra.mxu0 %v7779_v1 }
 0x1f5   :  { %7404 = vmatpush3.bf16.msra.mxu1 %v7779_v1  ;;  %7295 = vmatprep.subr.bf16.mxu0 %v7779_v1 }
 0x1f6   :  { %7405 = vmatprep.subr.bf16.mxu1 %v7779_v1 }
 0x1f8   :  { %7296 = vmatpush3.bf16.msra.mxu0 %v7779_v1 }
 0x1f9   :  { %v7669_v8 = vpop.eup %7668  ;;  %7406 = vmatpush3.bf16.msra.mxu1 %v7779_v1  ;;  %7297 = vmatprep.subr.bf16.mxu0 %v7779_v1 }
 0x1fa   :  { %v7671_v19 = vpop.eup %7670  ;;  %7407 = vmatprep.subr.bf16.mxu1 %v7779_v1  ;;  %v8410_v20 = vsub.f32 0.0, %v7669_v8 }
 0x1fb   :  { %v7673_v21 = vpop.eup %7672  ;;  %v1019_v25 = vmul.f32 0.6931472, %v7671_v19 }
 0x1fc   :  { %v7675_v26 = vpop.eup %7674  ;;  %7298 = vmatpush3.bf16.msra.mxu0 %v7779_v1  ;;  %5108 = vperm.xlu1 %7652, %v8410_v20   ;;  %v4963_v27 = vsub.f32 -0.5, %v8410_v20  ;;  %v8421_v28 = vsub.f32 0.0, %v7673_v21 }
 0x1fd   :  { %v1021_v12 = vadd.f32 %v1019_v25, %v7917_v36  ;;  %v1017_v33 = vmul.f32 0.6931472, %v7675_v26  ;;  %7408 = vmatpush3.bf16.msra.mxu1 %v7779_v1  ;;  %7299 = vmatprep.subr.bf16.mxu0 %v7779_v1 }
 0x1fe   :  { %7409 = vmatprep.subr.bf16.mxu1 %v7779_v1  ;;  %vm8438_vm4 = vcmp.gt.f32.partialorder %v4963_v27, 0.0  ;;  %v4962_v37 = vsub.f32 -0.5, %v8421_v28 }
 0x1ff   :  { %v1023_v36 = vsub.f32 %v1021_v12, %v8344_v58  ;;  %v1020_v38 = vadd.f32 %v1017_v33, %v7913_v32  ;;  %v5001_v39 = vsel %vm8438_vm4, 1, %v7778_v0  ;;  %v8465_v46 = vsel %vm8438_vm4, 1.0, %v7780_v7 }
 0x200   :  { %7300 = vmatpush3.bf16.msra.mxu0 %v7779_v1  ;;  %5092 = vperm.xlu0 %7653, %v5001_v39   ;;  %vm4964_vm5 = vcmp.gt.f32.partialorder %v4962_v37, 0.0  ;;  %v3070_v58 = vand.u32 4294901760, %v3069_v51  ;;  %v8650_v37 = vld [vmem:[#allocation2 + $0x48] sm:$0xff]  ;;  %v8656_v39 = vadd.f32 0.5, %v8421_v28 }
 0x201   :  { %v1022_v42 = vsub.f32 %v1020_v38, %v8347_v59  ;;  %7410 = vmatpush3.bf16.msra.mxu1 %v7779_v1  ;;  %7301 = vmatprep.subr.bf16.mxu0 %v7779_v1  ;;  %v1025_v32 = vmul.f32 %v8433_v34, %v1023_v36  ;;  %v8475_v49 = vsel %vm4964_vm5, 1.0, %v7780_v7  ;;  %v5000_v54 = vsel %vm4964_vm5, 1, %v7778_v0 }
 0x202   :  { %5103 = vperm.xlu1 %7652, %v8421_v28   ;;  %7411 = vmatprep.subr.bf16.mxu1 %v7779_v1  ;;  %v3561_v59 = vsub.f32 %v8460_v45, %v3560_v56  ;;  %v4463_v36 = vsel %vm7896_vm1, %v8650_v37, 0.0  ;;  %vm4952_vm9 = vcmp.ge.f32.partialorder %v8656_v39, 0.0 }
 0x203   :  { %v8470_v47 = vmul.f32 %v8465_v46, %v1025_v32  ;;  %v1024_v48 = vmul.f32 %v8449_v40, %v1022_v42  ;;  %v8669_v28 = vand.u32 4294901760, %v4463_v36 }
 0x204   :  { %7302 = vmatpush3.bf16.msra.mxu0 %v7779_v1  ;;  %v3562_v60 = vand.u32 4294901760, %v3561_v59 }
 0x205   :  { %7412 = vmatpush3.bf16.msra.mxu1 %v7779_v1  ;;  %7303 = vmatprep.subr.bf16.mxu0 %v7779_v1  ;;  %v8485_v55 = vmul.f32 %v8475_v49, %v1024_v48 }
 0x206   :  { %5089 = vperm.xlu1 %7652, %v5000_v54   ;;  %7413 = vmatprep.subr.bf16.mxu1 %v7779_v1 }
 0x208   :  { %7304 = vmatpush3.bf16.msra.mxu0 %v7779_v1 }
 0x209   :  { %7414 = vmatpush3.bf16.msra.mxu1 %v7779_v1  ;;  %7353 = vmatprep.subr.bf16.mxu0 %v7779_v1 }
 0x20a   :  { %7415 = vmatprep.subr.bf16.mxu1 %v7779_v1 }
 0x20b   :  { %6463 = vmatmul.mubr.f32.vlgmr.msra.gmra.mrb[4].mxu0 %v8277_v52  ;;  %v7677_v52 = vpop.eup %7676 }
 0x20c   :  { %7354 = vmatpush3.bf16.msra.mxu0 %v7779_v1  ;;  %6617 = vmatprep.mubr.f32.mxu0 %v3070_v58  ;;  %v8510_v2 = vand.u32 4294901760, %v7677_v52  ;;  %v8691_v58 = vsub.f32 %v4463_v36, %v8669_v28 }
 0x20d   :  { %7416 = vmatpush3.bf16.msra.mxu1 %v7779_v1  ;;  %7355 = vmatprep.subr.bf16.mxu0 %v7779_v1 }
 0x20e   :  { %6740 = vmatprep.subr.mxu1 %v7780_v7  ;;  %v8519_v5 = vsub.f32 %v7677_v52, %v8510_v2 }
 0x210   :  { %7356 = vmatpush3.bf16.msra.mxu0 %v7779_v1  ;;  %6738 = vmatmul.mubr.f32.vlgmr.msra.gmra.mrb[6].mxu1 %v3562_v60  ;;  %v3078_v11 = vand.u32 4294901760, %v8519_v5 }
 0x211   :  { %6742 = vmatprep.mubr.f32.mxu1 %v8363_v61  ;;  %7357 = vmatprep.subr.bf16.mxu0 %v7779_v1 }
 0x212   :  { %6741 = vmatpush3.msra.mxu1 %v7780_v7  ;;  %v3079_v6 = vsub.f32 %v8519_v5, %v3078_v11 }
 0x213   :  { %6745 = vmatprep.subr.mxu1 %v7780_v7 }
 0x214   :  { %7358 = vmatpush3.bf16.msra.mxu0 %v7779_v1 }
 0x215   :  { %7359 = vmatprep.subr.bf16.mxu0 %v7779_v1 }
 0x218   :  { %7360 = vmatpush3.bf16.msra.mxu0 %v7779_v1  ;;  %6743 = vmatmul.mubr.f32.vlgmr.msra.gmra.mrb[6].mxu1 %v8435_v9 }
 0x219   :  { %6747 = vmatprep.mubr.f32.mxu1 %v8372_v63  ;;  %7361 = vmatprep.subr.bf16.mxu0 %v7779_v1  ;;  %v3080_v63 = vand.u32 4294901760, %v3079_v6 }
 0x21a   :  { %6746 = vmatpush3.msra.mxu1 %v7780_v7 }
 0x21b   :  { %7417 = vmatprep.subr.bf16.mxu1 %v7779_v1 }
 0x21c   :  { %7362 = vmatpush3.bf16.msra.mxu0 %v7779_v1 }
 0x21d   :  { %7363 = vmatprep.subr.bf16.mxu0 %v7779_v1 }
 0x220   :  { %7364 = vmatpush3.bf16.msra.mxu0 %v7779_v1  ;;  %6748 = vmatmul.mubr.f32.vlgmr.msra.gmra.mrb[6].mxu1 %v8460_v45 }
 0x221   :  { %7418 = vmatpush3.bf16.msra.mxu1 %v7779_v1  ;;  %6782 = vmatprep.mubr.f32.mxu1 %v3550_v3 }
 0x222   :  { %7365 = vmatprep.subr.bf16.mxu0 %v7779_v1  ;;  %7419 = vmatprep.subr.bf16.mxu1 %v7779_v1 }
 0x224   :  { %7366 = vmatpush3.bf16.msra.mxu0 %v7779_v1 }
 0x225   :  { %7420 = vmatpush3.bf16.msra.mxu1 %v7779_v1  ;;  %7367 = vmatprep.subr.bf16.mxu0 %v7779_v1 }
 0x226   :  { %7421 = vmatprep.subr.bf16.mxu1 %v7779_v1 }
 0x228   :  { %7368 = vmatpush3.bf16.msra.mxu0 %v7779_v1 }
 0x229   :  { %7422 = vmatpush3.bf16.msra.mxu1 %v7779_v1  ;;  %6620 = vmatprep.subr.mxu0 %v7780_v7 }
 0x22a   :  { %7423 = vmatprep.subr.bf16.mxu1 %v7779_v1 }
 0x22b   :  { %6618 = vmatmul.mubr.f32.vlgmr.msra.gmra.mrb[6].mxu0 %v3080_v63  ;;  %v8700_v63 = vpop.xlane.xlu0 %3974 }
 0x22c   :  { %6621 = vmatpush3.msra.mxu0 %v7780_v7  ;;  %6622 = vmatprep.mubr.f32.mxu0 %v8405_v17 }
 0x22d   :  { %7424 = vmatpush3.bf16.msra.mxu1 %v7779_v1  ;;  %6625 = vmatprep.subr.mxu0 %v7780_v7 }
 0x22e   :  { %7425 = vmatprep.subr.bf16.mxu1 %v7779_v1 }
 0x231   :  { %7426 = vmatpush3.bf16.msra.mxu1 %v7779_v1 }
 0x232   :  { %7427 = vmatprep.subr.bf16.mxu1 %v7779_v1 }
 0x233   :  { %6623 = vmatmul.mubr.f32.vlgmr.msra.gmra.mrb[6].mxu0 %v8510_v2 }
 0x234   :  { %6626 = vmatpush3.msra.mxu0 %v7780_v7  ;;  %6627 = vmatprep.mubr.f32.mxu0 %v8424_v30 }
 0x235   :  { %7428 = vmatpush3.bf16.msra.mxu1 %v7779_v1  ;;  %7369 = vmatprep.subr.bf16.mxu0 %v7779_v1 }
 0x236   :  { %7429 = vmatprep.subr.bf16.mxu1 %v7779_v1 }
 0x239   :  { %7430 = vmatpush3.bf16.msra.mxu1 %v7779_v1 }
 0x23a   :  { %7431 = vmatprep.subr.bf16.mxu1 %v7779_v1 }
 0x23b   :  { %6628 = vmatmul.mubr.f32.vlgmr.msra.gmra.mrb[6].mxu0 %v8519_v5 }
 0x23c   :  { %7370 = vmatpush3.bf16.msra.mxu0 %v7779_v1  ;;  %6662 = vmatprep.mubr.f32.mxu0 %v3068_v41 }
 0x23d   :  { %7432 = vmatpush3.bf16.msra.mxu1 %v7779_v1  ;;  %7371 = vmatprep.subr.bf16.mxu0 %v7779_v1 }
 0x23e   :  { %6785 = vmatprep.subr.mxu1 %v7780_v7 }
 0x240   :  { %7372 = vmatpush3.bf16.msra.mxu0 %v7779_v1  ;;  %6783 = vmatmul.mubr.f32.vlgmr.msra.gmra.mrb[6].mxu1 %v3560_v56 }
 0x241   :  { %6787 = vmatprep.mubr.f32.mxu1 %v8363_v61  ;;  %7373 = vmatprep.subr.bf16.mxu0 %v7779_v1 }
 0x242   :  { %6786 = vmatpush3.msra.mxu1 %v7780_v7 }
 0x243   :  { %7433 = vmatprep.subr.bf16.mxu1 %v7779_v1 }
 0x244   :  { %7374 = vmatpush3.bf16.msra.mxu0 %v7779_v1 }
 0x245   :  { %7375 = vmatprep.subr.bf16.mxu0 %v7779_v1 }
 0x248   :  { %7376 = vmatpush3.bf16.msra.mxu0 %v7779_v1  ;;  %6788 = vmatmul.mubr.f32.vlgmr.msra.gmra.mrb[6].mxu1 %v8435_v9 }
 0x249   :  { %7434 = vmatpush3.bf16.msra.mxu1 %v7779_v1  ;;  %6822 = vmatprep.mubr.f32.mxu1 %v8363_v61  ;;  %v8589_v61 = vld [vmem:[#allocation2 + $0x40] sm:$0xff] }
 0x24a   :  { %7377 = vmatprep.subr.bf16.mxu0 %v7779_v1  ;;  %7435 = vmatprep.subr.bf16.mxu1 %v7779_v1  ;;  %v4462_v14 = vsel %vm7886_vm0, %v8589_v61, 0.0  ;;  %v3976_v19 = vsub.f32 %v8589_v61, %v8604_v18 }
 0x24b   :  { %v8577_v3 = vpop.f32.mrb[2].mxu1  ;;  %v8598_v15 = vand.u32 4294901760, %v4462_v14 }
 0x24c   :  { %7378 = vmatpush3.bf16.msra.mxu0 %v7779_v1  ;;  %v8580_v13 = vpop.f32.mrb[3].mxu1  ;;  %v3978_v23 = vmul.f32 1.442695, %v3976_v19 }
 0x24d   :  { %7436 = vmatpush3.bf16.msra.mxu1 %v7779_v1  ;;  %7379 = vmatprep.subr.bf16.mxu0 %v7779_v1  ;;  %v8607_v8 = vsub.f32 %v4462_v14, %v8598_v15 }
 0x24e   :  { %7437 = vmatprep.subr.bf16.mxu1 %v7779_v1  ;;  %7678 = vpow2.f32 %v3978_v23  ;;  %v4541_v23 = vand.u32 4294901760, %v8691_v58 }
 0x24f   :  { %v4531_v21 = vand.u32 4294901760, %v8607_v8 }
 0x250   :  { %7380 = vmatpush3.bf16.msra.mxu0 %v7779_v1 }
 0x251   :  { %7438 = vmatpush3.bf16.msra.mxu1 %v7779_v1  ;;  %7381 = vmatprep.subr.bf16.mxu0 %v7779_v1  ;;  %v4532_v24 = vsub.f32 %v8607_v8, %v4531_v21 }
 0x252   :  { %7439 = vmatprep.subr.bf16.mxu1 %v7779_v1 }
 0x253   :  { %v4533_v26 = vand.u32 4294901760, %v4532_v24 }
 0x254   :  { %7382 = vmatpush3.bf16.msra.mxu0 %v7779_v1 }
 0x255   :  { %7440 = vmatpush3.bf16.msra.mxu1 %v7779_v1  ;;  %7383 = vmatprep.subr.bf16.mxu0 %v7779_v1 }
 0x256   :  { %7441 = vmatprep.subr.bf16.mxu1 %v7779_v1 }
 0x258   :  { %7384 = vmatpush3.bf16.msra.mxu0 %v7779_v1 }
 0x259   :  { %7442 = vmatpush3.bf16.msra.mxu1 %v7779_v1  ;;  %6665 = vmatprep.subr.mxu0 %v7780_v7 }
 0x25a   :  { %7443 = vmatprep.subr.bf16.mxu1 %v7779_v1 }
 0x25b   :  { %6663 = vmatmul.mubr.f32.vlgmr.msra.gmra.mrb[6].mxu0 %v3078_v11 }
 0x25c   :  { %6666 = vmatpush3.msra.mxu0 %v7780_v7  ;;  %6667 = vmatprep.mubr.f32.mxu0 %v8405_v17 }
 0x25d   :  { %7444 = vmatpush3.bf16.msra.mxu1 %v7779_v1  ;;  %7385 = vmatprep.subr.bf16.mxu0 %v7779_v1 }
 0x25e   :  { %7445 = vmatprep.subr.bf16.mxu1 %v7779_v1 }
 0x261   :  { %7446 = vmatpush3.bf16.msra.mxu1 %v7779_v1 }
 0x262   :  { %7447 = vmatprep.subr.bf16.mxu1 %v7779_v1 }
 0x263   :  { %6668 = vmatmul.mubr.f32.vlgmr.msra.gmra.mrb[6].mxu0 %v8510_v2 }
 0x264   :  { %7386 = vmatpush3.bf16.msra.mxu0 %v7779_v1  ;;  %6702 = vmatprep.mubr.f32.mxu0 %v8405_v17  ;;  %v7679_v17 = vpop.eup %7678 }
 0x265   :  { %7448 = vmatpush3.bf16.msra.mxu1 %v7779_v1  ;;  %7387 = vmatprep.subr.bf16.mxu0 %v7779_v1  ;;  %v8640_v30 = vand.u32 4294901760, %v7679_v17 }
 0x266   :  { %7497 = vmatprep.subr.bf16.mxu1 %v7779_v1  ;;  %v6224_v25 = vpop.f32.mrb[2].mxu0 }
 0x267   :  { %7680 = vrcp.f32 %v6224_v25  ;;  %v1505_v27 = vpop.f32.mrb[3].mxu0  ;;  %v8664_v32 = vsub.f32 %v7679_v17, %v8640_v30 }
 0x268   :  { %7388 = vmatpush3.bf16.msra.mxu0 %v7779_v1  ;;  %6823 = vmatmul.mubr.f32.vlgmr.msra.gmra.mrb[6].mxu1 %v8435_v9  ;;  %7682 = vlog2.f32 %v6224_v25  ;;  %v8648_v9 = vadd.f32 0.5, %v8410_v20 }
 0x269   :  { %7498 = vmatpush3.bf16.msra.mxu1 %v7779_v1  ;;  %6977 = vmatprep.mubr.f32.mxu1 %v4533_v26  ;;  %7684 = vrcp.f32 %v1505_v27  ;;  %v4049_v54 = vand.u32 4294901760, %v8664_v32 }
 0x26a   :  { %7686 = vlog2.f32 %v1505_v27  ;;  %7389 = vmatprep.subr.bf16.mxu0 %v7779_v1  ;;  %7499 = vmatprep.subr.bf16.mxu1 %v7779_v1  ;;  %vm4953_vm6 = vcmp.ge.f32.partialorder %v8648_v9, 0.0 }
 0x26c   :  { %7390 = vmatpush3.bf16.msra.mxu0 %v7779_v1 }
 0x26d   :  { %7500 = vmatpush3.bf16.msra.mxu1 %v7779_v1  ;;  %7391 = vmatprep.subr.bf16.mxu0 %v7779_v1 }
 0x26e   :  { %7501 = vmatprep.subr.bf16.mxu1 %v7779_v1 }
 0x270   :  { %7392 = vmatpush3.bf16.msra.mxu0 %v7779_v1 }
 0x271   :  { %v7681_v31 = vpop.eup %7680  ;;  %7502 = vmatpush3.bf16.msra.mxu1 %v7779_v1  ;;  %7393 = vmatprep.subr.bf16.mxu0 %v7779_v1 }
 0x272   :  { %v7683_v12 = vpop.eup %7682  ;;  %7503 = vmatprep.subr.bf16.mxu1 %v7779_v1  ;;  %v8645_v33 = vsub.f32 0.0, %v7681_v31 }
 0x273   :  { %v7685_v35 = vpop.eup %7684  ;;  %v2000_v38 = vmul.f32 0.6931472, %v7683_v12 }
 0x274   :  { %v7687_v41 = vpop.eup %7686  ;;  %7394 = vmatpush3.bf16.msra.mxu0 %v7779_v1  ;;  %5121 = vperm.xlu1 %7652, %v8645_v33   ;;  %v8660_v42 = vsub.f32 0.0, %v7685_v35  ;;  %v4967_v20 = vsub.f32 -0.6, %v8645_v33 }
 0x275   :  { %v2002_v45 = vadd.f32 %v2000_v38, %v8058_v4  ;;  %v1998_v22 = vmul.f32 0.6931472, %v7687_v41  ;;  %7504 = vmatpush3.bf16.msra.mxu1 %v7779_v1  ;;  %7395 = vmatprep.subr.bf16.mxu0 %v7779_v1 }
 0x276   :  { %7505 = vmatprep.subr.bf16.mxu1 %v7779_v1  ;;  %vm4969_vm7 = vcmp.gt.f32.partialorder %v4967_v20, 0.0  ;;  %v4966_v48 = vsub.f32 -0.6, %v8660_v42 }
 0x277   :  { %v2004_v10 = vsub.f32 %v2002_v45, %v8577_v3  ;;  %v2001_v50 = vadd.f32 %v1998_v22, %v7998_v53  ;;  %vm4971_vm8 = vmand %vm4969_vm7, %vm4953_vm6  ;;  %v3977_v3 = vsub.f32 %v8650_v37, %v8700_v63  ;;  %v8853_v22 = vadd.f32 0.6, %v8645_v33 }
 0x278   :  { %7396 = vmatpush3.bf16.msra.mxu0 %v7779_v1  ;;  %5116 = vperm.xlu1 %7652, %v8660_v42   ;;  %v5005_v4 = vsel %vm4971_vm8, 1, %v7778_v0  ;;  %v5228_v51 = vsel %vm4971_vm8, 1.0, %v7780_v7  ;;  %vm4968_vm10 = vcmp.gt.f32.partialorder %v4966_v48, 0.0 }
 0x279   :  { %v2003_v56 = vsub.f32 %v2001_v50, %v8580_v13  ;;  %7506 = vmatpush3.bf16.msra.mxu1 %v7779_v1  ;;  %7397 = vmatprep.subr.bf16.mxu0 %v7779_v1  ;;  %v2006_v53 = vmul.f32 %v8433_v34, %v2004_v10  ;;  %v5023_v57 = vmul.f32 2.0, %v5228_v51  ;;  %vm4970_vm11 = vmand %vm4968_vm10, %vm4952_vm9  ;;  %v4050_v13 = vsub.f32 %v8664_v32, %v4049_v54 }
 0x27a   :  { %7507 = vmatprep.subr.bf16.mxu1 %v7779_v1  ;;  %5082 = vperm.xlu0 %7653, %v5005_v4   ;;  %v5004_v59 = vsel %vm4970_vm11, 1, %v7778_v0  ;;  %v5227_v60 = vsel %vm4970_vm11, 1.0, %v7780_v7  ;;  %v3980_v25 = vmul.f32 1.442695, %v3977_v3  ;;  %v8861_v50 = vadd.f32 0.6, %v8660_v42 }
 0x27b   :  { %v8697_v52 = vadd.f32 %v8465_v46, %v5023_v57  ;;  %v5043_v5 = vmul.f32 %v5228_v51, %v2006_v53  ;;  %v5022_v11 = vmul.f32 2.0, %v5227_v60  ;;  %v2005_v6 = vmul.f32 %v8449_v40, %v2003_v56  ;;  %v5109_v36 = vpop.permute.xlu1 %5108 }
 0x27c   :  { %7398 = vmatpush3.bf16.msra.mxu0 %v7779_v1  ;;  %5079 = vperm.xlu1 %7652, %v5004_v59   ;;  %v4051_v26 = vand.u32 4294901760, %v4050_v13  ;;  %7688 = vpow2.f32 %v3980_v25  ;;  %vm4957_vm14 = vcmp.ge.f32.partialorder %v8853_v22, 0.0  ;;  %vm4956_vm1 = vcmp.ge.f32.partialorder %v8861_v50, 0.0 }
 0x27d   :  { %7508 = vmatpush3.bf16.msra.mxu1 %v7779_v1  ;;  %v8710_v46 = vadd.f32 %v5043_v5, %v8470_v47  ;;  %7399 = vmatprep.subr.bf16.mxu0 %v7779_v1  ;;  %v8714_v14 = vadd.f32 %v8475_v49, %v5022_v11  ;;  %v5042_v19 = vmul.f32 %v5227_v60, %v2005_v6 }
 0x27e   :  { %7509 = vmatprep.subr.bf16.mxu1 %v7779_v1  ;;  %v4542_v47 = vsub.f32 %v8691_v58, %v4541_v23 }
 0x27f   :  { %v8719_v24 = vadd.f32 %v5042_v19, %v8485_v55 }
 0x280   :  { %7400 = vmatpush3.bf16.msra.mxu0 %v7779_v1  ;;  %v4543_v49 = vand.u32 4294901760, %v4542_v47 }
 0x281   :  { %7510 = vmatpush3.bf16.msra.mxu1 %v7779_v1  ;;  %7449 = vmatprep.subr.bf16.mxu0 %v7779_v1  ;;  %v5104_v38 = vpop.permute.xlu1 %5103 }
 0x282   :  { %7511 = vmatprep.subr.bf16.mxu1 %v7779_v1 }
 0x283   :  { %6703 = vmatmul.mubr.f32.vlgmr.msra.gmra.mrb[6].mxu0 %v8510_v2 }
 0x284   :  { %7450 = vmatpush3.bf16.msra.mxu0 %v7779_v1  ;;  %6857 = vmatprep.mubr.f32.mxu0 %v4051_v26 }
 0x285   :  { %7512 = vmatpush3.bf16.msra.mxu1 %v7779_v1  ;;  %7451 = vmatprep.subr.bf16.mxu0 %v7779_v1 }
 0x286   :  { %6980 = vmatprep.subr.mxu1 %v7780_v7  ;;  %v7689_v55 = vpop.eup %7688 }
 0x287   :  { %v8742_v2 = vand.u32 4294901760, %v7689_v55 }
 0x288   :  { %7452 = vmatpush3.bf16.msra.mxu0 %v7779_v1  ;;  %6978 = vmatmul.mubr.f32.vlgmr.msra.gmra.mrb[8].mxu1 %v4543_v49  ;;  %v5111_v49 = vsel %vm5100_vm13, %v5104_v38, 0.0 }
 0x289   :  { %6982 = vmatprep.mubr.f32.mxu1 %v8598_v15  ;;  %7453 = vmatprep.subr.bf16.mxu0 %v7779_v1  ;;  %v8751_v27 = vsub.f32 %v7689_v55, %v8742_v2 }
 0x28a   :  { %6981 = vmatpush3.msra.mxu1 %v7780_v7 }
 0x28b   :  { %6985 = vmatprep.subr.mxu1 %v7780_v7  ;;  %v4059_v17 = vand.u32 4294901760, %v8751_v27 }
 0x28c   :  { %7454 = vmatpush3.bf16.msra.mxu0 %v7779_v1 }
 0x28d   :  { %7455 = vmatprep.subr.bf16.mxu0 %v7779_v1  ;;  %v4060_v31 = vsub.f32 %v8751_v27, %v4059_v17 }
 0x290   :  { %7456 = vmatpush3.bf16.msra.mxu0 %v7779_v1  ;;  %6983 = vmatmul.mubr.f32.vlgmr.msra.gmra.mrb[8].mxu1 %v8669_v28 }
 0x291   :  { %6987 = vmatprep.mubr.f32.mxu1 %v8607_v8  ;;  %7457 = vmatprep.subr.bf16.mxu0 %v7779_v1  ;;  %v4061_v8 = vand.u32 4294901760, %v4060_v31 }
 0x292   :  { %6986 = vmatpush3.msra.mxu1 %v7780_v7 }
 0x293   :  { %7513 = vmatprep.subr.bf16.mxu1 %v7779_v1 }
 0x294   :  { %7458 = vmatpush3.bf16.msra.mxu0 %v7779_v1 }
 0x295   :  { %7459 = vmatprep.subr.bf16.mxu0 %v7779_v1 }
 0x298   :  { %7460 = vmatpush3.bf16.msra.mxu0 %v7779_v1  ;;  %6988 = vmatmul.mubr.f32.vlgmr.msra.gmra.mrb[8].mxu1 %v8691_v58  ;;  %v5112_v58 = vsel %vm5100_vm13, %v5109_v36, 0.0 }
 0x299   :  { %7514 = vmatpush3.bf16.msra.mxu1 %v7779_v1  ;;  %7022 = vmatprep.mubr.f32.mxu1 %v4531_v21 }
 0x29a   :  { %7461 = vmatprep.subr.bf16.mxu0 %v7779_v1  ;;  %7515 = vmatprep.subr.bf16.mxu1 %v7779_v1 }
 0x29c   :  { %7462 = vmatpush3.bf16.msra.mxu0 %v7779_v1 }
 0x29d   :  { %7516 = vmatpush3.bf16.msra.mxu1 %v7779_v1  ;;  %7463 = vmatprep.subr.bf16.mxu0 %v7779_v1 }
 0x29e   :  { %7517 = vmatprep.subr.bf16.mxu1 %v7779_v1 }
 0x2a0   :  { %7464 = vmatpush3.bf16.msra.mxu0 %v7779_v1 }
 0x2a1   :  { %7518 = vmatpush3.bf16.msra.mxu1 %v7779_v1  ;;  %6860 = vmatprep.subr.mxu0 %v7780_v7 }
 0x2a2   :  { %7519 = vmatprep.subr.bf16.mxu1 %v7779_v1 }
 0x2a3   :  { %6858 = vmatmul.mubr.f32.vlgmr.msra.gmra.mrb[8].mxu0 %v4061_v8 }
 0x2a4   :  { %6861 = vmatpush3.msra.mxu0 %v7780_v7  ;;  %6862 = vmatprep.mubr.f32.mxu0 %v8640_v30 }
 0x2a5   :  { %7520 = vmatpush3.bf16.msra.mxu1 %v7779_v1  ;;  %6865 = vmatprep.subr.mxu0 %v7780_v7 }
 0x2a6   :  { %7521 = vmatprep.subr.bf16.mxu1 %v7779_v1 }
 0x2a9   :  { %7522 = vmatpush3.bf16.msra.mxu1 %v7779_v1 }
 0x2aa   :  { %7523 = vmatprep.subr.bf16.mxu1 %v7779_v1 }
 0x2ab   :  { %6863 = vmatmul.mubr.f32.vlgmr.msra.gmra.mrb[8].mxu0 %v8742_v2 }
 0x2ac   :  { %6866 = vmatpush3.msra.mxu0 %v7780_v7  ;;  %6867 = vmatprep.mubr.f32.mxu0 %v8664_v32 }
 0x2ad   :  { %7524 = vmatpush3.bf16.msra.mxu1 %v7779_v1  ;;  %7465 = vmatprep.subr.bf16.mxu0 %v7779_v1 }
 0x2ae   :  { %7525 = vmatprep.subr.bf16.mxu1 %v7779_v1 }
 0x2b1   :  { %7526 = vmatpush3.bf16.msra.mxu1 %v7779_v1 }
 0x2b2   :  { %7527 = vmatprep.subr.bf16.mxu1 %v7779_v1 }
 0x2b3   :  { %6868 = vmatmul.mubr.f32.vlgmr.msra.gmra.mrb[8].mxu0 %v8751_v27 }
 0x2b4   :  { %7466 = vmatpush3.bf16.msra.mxu0 %v7779_v1  ;;  %6902 = vmatprep.mubr.f32.mxu0 %v4049_v54  ;;  %v8868_v54 = vpop.permute.xlu1 %5089 }
 0x2b5   :  { %7528 = vmatpush3.bf16.msra.mxu1 %v7779_v1  ;;  %7467 = vmatprep.subr.bf16.mxu0 %v7779_v1 }
 0x2b6   :  { %7025 = vmatprep.subr.mxu1 %v7780_v7 }
 0x2b8   :  { %7468 = vmatpush3.bf16.msra.mxu0 %v7779_v1  ;;  %7023 = vmatmul.mubr.f32.vlgmr.msra.gmra.mrb[8].mxu1 %v4541_v23 }
 0x2b9   :  { %7027 = vmatprep.mubr.f32.mxu1 %v8598_v15  ;;  %7469 = vmatprep.subr.bf16.mxu0 %v7779_v1 }
 0x2ba   :  { %7026 = vmatpush3.msra.mxu1 %v7780_v7 }
 0x2bb   :  { %7529 = vmatprep.subr.bf16.mxu1 %v7779_v1 }
 0x2bc   :  { %7470 = vmatpush3.bf16.msra.mxu0 %v7779_v1 }
 0x2bd   :  { %7471 = vmatprep.subr.bf16.mxu0 %v7779_v1 }
 0x2c0   :  { %7472 = vmatpush3.bf16.msra.mxu0 %v7779_v1  ;;  %7028 = vmatmul.mubr.f32.vlgmr.msra.gmra.mrb[8].mxu1 %v8669_v28 }
 0x2c1   :  { %7530 = vmatpush3.bf16.msra.mxu1 %v7779_v1  ;;  %7062 = vmatprep.mubr.f32.mxu1 %v8598_v15 }
 0x2c2   :  { %7473 = vmatprep.subr.bf16.mxu0 %v7779_v1  ;;  %7531 = vmatprep.subr.bf16.mxu1 %v7779_v1 }
 0x2c3   :  { %v8809_v21 = vpop.f32.mrb[4].mxu1 }
 0x2c4   :  { %7474 = vmatpush3.bf16.msra.mxu0 %v7779_v1  ;;  %v8812_v12 = vpop.f32.mrb[5].mxu1 }
 0x2c5   :  { %7532 = vmatpush3.bf16.msra.mxu1 %v7779_v1  ;;  %7475 = vmatprep.subr.bf16.mxu0 %v7779_v1 }
 0x2c6   :  { %7533 = vmatprep.subr.bf16.mxu1 %v7779_v1 }
 0x2c8   :  { %7476 = vmatpush3.bf16.msra.mxu0 %v7779_v1 }
 0x2c9   :  { %7534 = vmatpush3.bf16.msra.mxu1 %v7779_v1  ;;  %7477 = vmatprep.subr.bf16.mxu0 %v7779_v1 }
 0x2ca   :  { %7535 = vmatprep.subr.bf16.mxu1 %v7779_v1 }
 0x2cc   :  { %7478 = vmatpush3.bf16.msra.mxu0 %v7779_v1 }
 0x2cd   :  { %7536 = vmatpush3.bf16.msra.mxu1 %v7779_v1  ;;  %7479 = vmatprep.subr.bf16.mxu0 %v7779_v1 }
 0x2ce   :  { %7537 = vmatprep.subr.bf16.mxu1 %v7779_v1 }
 0x2d0   :  { %7480 = vmatpush3.bf16.msra.mxu0 %v7779_v1 }
 0x2d1   :  { %7538 = vmatpush3.bf16.msra.mxu1 %v7779_v1  ;;  %6905 = vmatprep.subr.mxu0 %v7780_v7 }
 0x2d2   :  { %7539 = vmatprep.subr.bf16.mxu1 %v7779_v1 }
 0x2d3   :  { %6903 = vmatmul.mubr.f32.vlgmr.msra.gmra.mrb[8].mxu0 %v4059_v17 }
 0x2d4   :  { %6906 = vmatpush3.msra.mxu0 %v7780_v7  ;;  %6907 = vmatprep.mubr.f32.mxu0 %v8640_v30 }
 0x2d5   :  { %7540 = vmatpush3.bf16.msra.mxu1 %v7779_v1  ;;  %7481 = vmatprep.subr.bf16.mxu0 %v7779_v1 }
 0x2d6   :  { %7541 = vmatprep.subr.bf16.mxu1 %v7779_v1 }
 0x2d9   :  { %7542 = vmatpush3.bf16.msra.mxu1 %v7779_v1 }
 0x2da   :  { %7543 = vmatprep.subr.bf16.mxu1 %v7779_v1 }
 0x2db   :  { %6908 = vmatmul.mubr.f32.vlgmr.msra.gmra.mrb[8].mxu0 %v8742_v2 }
 0x2dc   :  { %7482 = vmatpush3.bf16.msra.mxu0 %v7779_v1  ;;  %6942 = vmatprep.mubr.f32.mxu0 %v8640_v30 }
 0x2dd   :  { %7544 = vmatpush3.bf16.msra.mxu1 %v7779_v1  ;;  %7483 = vmatprep.subr.bf16.mxu0 %v7779_v1 }
 0x2de   :  { %v6464_v15 = vpop.f32.mrb[4].mxu0 }
 0x2df   :  { %7690 = vrcp.f32 %v6464_v15  ;;  %v2486_v35 = vpop.f32.mrb[5].mxu0 }
 0x2e0   :  { %7484 = vmatpush3.bf16.msra.mxu0 %v7779_v1  ;;  %7063 = vmatmul.mubr.f32.vlgmr.msra.gmra.mrb[8].mxu1 %v8669_v28  ;;  %7692 = vlog2.f32 %v6464_v15  ;;  %v8916_v15 = vpop.permute.xlu0 %5092 }
 0x2e1   :  { %7694 = vrcp.f32 %v2486_v35  ;;  %7485 = vmatprep.subr.bf16.mxu0 %v7779_v1 }
 0x2e2   :  { %7696 = vlog2.f32 %v2486_v35 }
 0x2e4   :  { %7486 = vmatpush3.bf16.msra.mxu0 %v7779_v1 }
 0x2e5   :  { %7487 = vmatprep.subr.bf16.mxu0 %v7779_v1 }
 0x2e8   :  { %7488 = vmatpush3.bf16.msra.mxu0 %v7779_v1 }
 0x2e9   :  { %v7691_v30 = vpop.eup %7690  ;;  %7489 = vmatprep.subr.bf16.mxu0 %v7779_v1 }
 0x2ea   :  { %v7693_v41 = vpop.eup %7692  ;;  %v8850_v20 = vsub.f32 0.0, %v7691_v30 }
 0x2eb   :  { %v7695_v32 = vpop.eup %7694  ;;  %v2981_v45 = vmul.f32 0.6931472, %v7693_v41 }
 0x2ec   :  { %v7697_v28 = vpop.eup %7696  ;;  %7490 = vmatpush3.bf16.msra.mxu0 %v7779_v1  ;;  %5134 = vperm.xlu0 %7653, %v8850_v20   ;;  %v8857_v48 = vsub.f32 0.0, %v7695_v32  ;;  %v4973_v10 = vsub.f32 -0.7, %v8850_v20  ;;  %v5222_v35 = vadd.f32 0.7, %v8850_v20 }
 0x2ed   :  { %v2983_v4 = vadd.f32 %v2981_v45, %v8240_v43  ;;  %v2979_v51 = vmul.f32 0.6931472, %v7697_v28  ;;  %7491 = vmatprep.subr.bf16.mxu0 %v7779_v1 }
 0x2ee   :  { %5129 = vperm.xlu1 %7652, %v8857_v48   ;;  %vm4975_vm12 = vcmp.gt.f32.partialorder %v4973_v10, 0.0  ;;  %v4972_v33 = vsub.f32 -0.7, %v8857_v48  ;;  %vm4961_vm11 = vcmp.ge.f32.partialorder %v5222_v35, 0.0 }
 0x2ef   :  { %v2985_v56 = vsub.f32 %v2983_v4, %v8809_v21  ;;  %v2982_v53 = vadd.f32 %v2979_v51, %v8180_v29  ;;  %vm4977_vm15 = vmand %vm4975_vm12, %vm4953_vm6 }
 0x2f0   :  { %7492 = vmatpush3.bf16.msra.mxu0 %v7779_v1  ;;  %vm4979_vm0 = vmand %vm4977_vm15, %vm4957_vm14  ;;  %vm4974_vm2 = vcmp.gt.f32.partialorder %v4972_v33, 0.0  ;;  %vm5126_vm15 = vcmp.eq.s32.totalorder %v7883_v16, 2 }
 0x2f1   :  { %v2984_v43 = vsub.f32 %v2982_v53, %v8812_v12  ;;  %7493 = vmatprep.subr.bf16.mxu0 %v7779_v1  ;;  %v2987_v29 = vmul.f32 %v8433_v34, %v2985_v56  ;;  %v5009_v42 = vsel %vm4979_vm0, 1, %v7778_v0  ;;  %v5230_v57 = vsel %vm4979_vm0, 1.0, %v7780_v7  ;;  %vm4976_vm4 = vmand %vm4974_vm2, %vm4952_vm9 }
 0x2f2   :  { %v5027_v59 = vmul.f32 3.0, %v5230_v57  ;;  %5072 = vperm.xlu0 %7653, %v5009_v42   ;;  %vm4978_vm5 = vmand %vm4976_vm4, %vm4956_vm1  ;;  %v5221_v53 = vadd.f32 0.7, %v8857_v48 }
 0x2f3   :  { %v5047_v60 = vmul.f32 %v5230_v57, %v2987_v29  ;;  %v5008_v5 = vsel %vm4978_vm5, 1, %v7778_v0  ;;  %v5229_v11 = vsel %vm4978_vm5, 1.0, %v7780_v7  ;;  %v2986_v6 = vmul.f32 %v8449_v40, %v2984_v43  ;;  %v5122_v3 = vpop.permute.xlu1 %5121 }
 0x2f4   :  { %7494 = vmatpush3.bf16.msra.mxu0 %v7779_v1  ;;  %v8896_v13 = vadd.f32 %v5027_v59, %v8697_v52  ;;  %v5026_v19 = vmul.f32 3.0, %v5229_v11  ;;  %5069 = vperm.xlu1 %7652, %v5008_v5   ;;  %v5125_v23 = vsel %vm5113_vm3, %v5122_v3, %v5112_v58 }
 0x2f5   :  { %v8901_v25 = vadd.f32 %v5047_v60, %v8710_v46  ;;  %7495 = vmatprep.subr.bf16.mxu0 %v7779_v1  ;;  %v5046_v26 = vmul.f32 %v5229_v11, %v2986_v6 }
 0x2f6   :  { %v8905_v47 = vadd.f32 %v5026_v19, %v8714_v14 }
 0x2f7   :  { %v8910_v52 = vadd.f32 %v5046_v26, %v8719_v24  ;;  %v5117_v55 = vpop.permute.xlu1 %5116 }
 0x2f8   :  { %7496 = vmatpush3.bf16.msra.mxu0 %v7779_v1  ;;  %v5124_v27 = vsel %vm5113_vm3, %v5117_v55, %v5111_v49 }
 0x2f9   :  { %v8920_v28 = vpop.permute.xlu0 %5082 }
 0x2fb   :  { %6943 = vmatmul.mubr.f32.vlgmr.msra.gmra.mrb[8].mxu0 %v8742_v2  ;;  %v8927_v20 = vpop.permute.xlu1 %5079 }
 0x33b   :  { %v6824_v46 = vpop.f32.mrb[6].mxu1 }
 0x33c   :  { %v3949_v17 = vpop.f32.mrb[7].mxu1 }
 0x356   :  { %v6704_v31 = vpop.f32.mrb[6].mxu0 }
 0x357   :  { %7698 = vrcp.f32 %v6704_v31  ;;  %v3467_v14 = vpop.f32.mrb[7].mxu0 }
 0x358   :  { %7700 = vlog2.f32 %v6704_v31 }
 0x359   :  { %7702 = vrcp.f32 %v3467_v14 }
 0x35a   :  { %7704 = vlog2.f32 %v3467_v14 }
 0x361   :  { %v7699_v8 = vpop.eup %7698 }
 0x362   :  { %v7701_v21 = vpop.eup %7700  ;;  %v3480_v24 = vsub.f32 0.0, %v7699_v8 }
 0x363   :  { %v7703_v12 = vpop.eup %7702  ;;  %v3962_v1 = vmul.f32 0.6931472, %v7701_v21 }
 0x364   :  { %v7705_v36 = vpop.eup %7704  ;;  %5147 = vperm.xlu0 %7653, %v3480_v24   ;;  %v3479_v2 = vsub.f32 0.0, %v7703_v12  ;;  %v4981_v30 = vsub.f32 -0.8, %v3480_v24  ;;  %v5224_v38 = vadd.f32 0.8, %v3480_v24 }
 0x365   :  { %v3964_v41 = vadd.f32 %v3962_v1, %v8457_v44  ;;  %v3960_v32 = vmul.f32 0.6931472, %v7705_v36 }
 0x366   :  { %5142 = vperm.xlu1 %7652, %v3479_v2   ;;  %vm4983_vm7 = vcmp.gt.f32.partialorder %v4981_v30, 0.0  ;;  %v4980_v45 = vsub.f32 -0.8, %v3479_v2  ;;  %vm4993_vm10 = vcmp.ge.f32.partialorder %v5224_v38, 0.0  ;;  %v5223_v33 = vadd.f32 0.8, %v3479_v2 }
 0x367   :  { %v3966_v10 = vsub.f32 %v3964_v41, %v6824_v46  ;;  %v3963_v4 = vadd.f32 %v3960_v32, %v8366_v62  ;;  %vm4985_vm8 = vmand %vm4983_vm7, %vm4953_vm6 }
 0x368   :  { %vm4987_vm12 = vmand %vm4985_vm8, %vm4957_vm14  ;;  %vm4982_vm2 = vcmp.gt.f32.partialorder %v4980_v45, 0.0  ;;  %vm4992_vm5 = vcmp.ge.f32.partialorder %v5223_v33, 0.0 }
 0x369   :  { %v3965_v44 = vsub.f32 %v3963_v4, %v3949_v17  ;;  %v3968_v51 = vmul.f32 %v8433_v34, %v3966_v10  ;;  %vm4989_vm13 = vmand %vm4987_vm12, %vm4961_vm11 }
 0x36a   :  { %vm4995_vm0 = vmand %vm4993_vm10, %vm4953_vm6  ;;  %v5013_v62 = vsel %vm4989_vm13, 1, %v7778_v0  ;;  %v5232_v56 = vsel %vm4989_vm13, 1.0, %v7780_v7 }
 0x36b   :  { %vm4997_vm3 = vmand %vm4995_vm0, %vm4957_vm14  ;;  %v5031_v43 = vmul.f32 4.0, %v5232_v56  ;;  %v5051_v29 = vmul.f32 %v5232_v56, %v3968_v51  ;;  %5062 = vperm.xlu1 %7652, %v5013_v62   ;;  %v3967_v42 = vmul.f32 %v8449_v40, %v3965_v44  ;;  %v5135_v57 = vpop.permute.xlu0 %5134  ;;  %vm4960_vm14 = vcmp.ge.f32.partialorder %v5221_v53, 0.0  ;;  %v7721_v62 = vld [vmem:[#allocation2 + $0x18] sm:$0xff]  ;;  %v7722_v53 = vld [vmem:[#allocation2 + $0x8] sm:$0xff] }
 0x36c   :  { %vm4999_vm4 = vmand %vm4997_vm3, %vm4961_vm11  ;;  %v5138_v9 = vsel %vm5126_vm15, %v5135_v57, %v5125_v23  ;;  %vm5095_vm0 = vcmp.eq.s32.totalorder %v8916_v15, 1  ;;  %v7725_v15 = vld [vmem:[#allocation2 + $0x10] sm:$0xff] }
 0x36d   :  { %v5234_v58 = vsel %vm4999_vm4, 1.0, %v7780_v7  ;;  %vm4984_vm6 = vmand %vm4982_vm2, %vm4952_vm9  ;;  %v5130_v48 = vpop.permute.xlu1 %5129  ;;  %v5053_v22 = vadd.f32 %v5051_v29, %v8901_v25  ;;  %v5033_v59 = vadd.f32 %v5031_v43, %v8896_v13  ;;  %vm5084_vm4 = vcmp.eq.s32.totalorder %v8927_v20, 1 }
 0x36e   :  { %vm4986_vm7 = vmand %vm4984_vm6, %vm4956_vm1  ;;  %v5137_v60 = vsel %vm5126_vm15, %v5130_v48, %v5124_v27  ;;  %v5035_v5 = vmul.f32 5.0, %v5234_v58  ;;  %vm5085_vm15 = vcmp.eq.s32.totalorder %v8920_v28, 1  ;;  %v7724_v28 = vld [vmem:[#allocation2 + $0x20] sm:$0xff]  ;;  %vm5094_vm6 = vcmp.eq.s32.totalorder %v8868_v54, 1 }
 0x36f   :  { %vm4988_vm8 = vmand %vm4986_vm7, %vm4960_vm14 }
 0x370   :  { %vm4994_vm10 = vmand %vm4992_vm5, %vm4952_vm9  ;;  %v5012_v11 = vsel %vm4988_vm8, 1, %v7778_v0  ;;  %v5231_v6 = vsel %vm4988_vm8, 1.0, %v7780_v7  ;;  %v5037_v3 = vadd.f32 %v5035_v5, %v5033_v59  ;;  %vm5139_vm9 = vcmp.eq.s32.totalorder %v7883_v16, 3 }
 0x371   :  { %vm4996_vm11 = vmand %vm4994_vm10, %vm4956_vm1  ;;  %v5030_v13 = vmul.f32 4.0, %v5231_v6  ;;  %5059 = vperm.xlu0 %7653, %v5012_v11   ;;  %v5050_v19 = vmul.f32 %v5231_v6, %v3967_v42  ;;  %v5073_v24 = vpop.permute.xlu0 %5072  ;;  %v7723_v42 = vld [vmem:[#allocation2 + $0x30] sm:$0xff] }
 0x372   :  { %vm4998_vm12 = vmand %vm4996_vm11, %vm4960_vm14  ;;  %vm5075_vm13 = vcmp.eq.s32.totalorder %v5073_v24, 1 }
 0x373   :  { %v5233_v23 = vsel %vm4998_vm12, 1.0, %v7780_v7  ;;  %v5052_v25 = vadd.f32 %v5050_v19, %v8910_v52  ;;  %v5032_v26 = vadd.f32 %v5030_v13, %v8905_v47  ;;  %v5070_v35 = vpop.permute.xlu1 %5069 }
 0x374   :  { %v5034_v39 = vmul.f32 5.0, %v5233_v23  ;;  %vm5074_vm3 = vcmp.eq.s32.totalorder %v5070_v35, 1 }
 0x376   :  { %v5036_v49 = vadd.f32 %v5034_v39, %v5032_v26 }
 0x3b3   :  { %v7064_v55 = vpop.f32.mrb[8].mxu1 }
 0x3b4   :  { %v4930_v0 = vpop.f32.mrb[9].mxu1 }
 0x3ce   :  { %v6944_v27 = vpop.f32.mrb[8].mxu0 }
 0x3cf   :  { %7706 = vrcp.f32 %v6944_v27  ;;  %v4448_v46 = vpop.f32.mrb[9].mxu0 }
 0x3d0   :  { %7708 = vlog2.f32 %v6944_v27 }
 0x3d1   :  { %7710 = vrcp.f32 %v4448_v46 }
 0x3d2   :  { %7712 = vlog2.f32 %v4448_v46 }
 0x3d9   :  { %v7707_v50 = vpop.eup %7706 }
 0x3da   :  { %v7709_v17 = vpop.eup %7708  ;;  %v4461_v31 = vsub.f32 0.0, %v7707_v50 }
 0x3db   :  { %v7711_v14 = vpop.eup %7710  ;;  %v4943_v8 = vmul.f32 0.6931472, %v7709_v17 }
 0x3dc   :  { %v7713_v7 = vpop.eup %7712  ;;  %v4460_v21 = vsub.f32 0.0, %v7711_v14  ;;  %5160 = vperm.xlu0 %7653, %v4461_v31  }
 0x3dd   :  { %v4945_v47 = vadd.f32 %v4943_v8, %v8700_v63  ;;  %v4941_v52 = vmul.f32 0.6931472, %v7713_v7 }
 0x3de   :  { %5155 = vperm.xlu1 %7652, %v4460_v21  }
 0x3df   :  { %v4947_v12 = vsub.f32 %v4945_v47, %v7064_v55  ;;  %v4944_v1 = vadd.f32 %v4941_v52, %v8604_v18  ;;  %v7719_v18 = vld [vmem:[#allocation2 + $0x38] sm:$0xff] }
 0x3e1   :  { %v4946_v36 = vsub.f32 %v4944_v1, %v4930_v0  ;;  %v4949_v2 = vmul.f32 %v8433_v34, %v4947_v12  ;;  %v7720_v34 = vld [vmem:[#allocation2 + $0x28] sm:$0xff] }
 0x3e3   :  { %v5148_v30 = vpop.permute.xlu0 %5147  ;;  %v5055_v38 = vmul.f32 %v5234_v58, %v4949_v2  ;;  %v4948_v41 = vmul.f32 %v8449_v40, %v4946_v36  ;;  %v7726_v58 = vld [vmem:[#allocation2] sm:$0xff] }
 0x3e4   :  { %v5151_v32 = vsel %vm5139_vm9, %v5148_v30, %v5138_v9 }
 0x3e5   :  { %v5057_v45 = vadd.f32 %v5055_v38, %v5053_v22  ;;  %v5143_v10 = vpop.permute.xlu1 %5142  ;;  %v5054_v63 = vmul.f32 %v5233_v23, %v4948_v41 }
 0x3e6   :  { %v5150_v4 = vsel %vm5139_vm9, %v5143_v10, %v5137_v60 }
 0x3e7   :  { %5173 = vperm.xlu0 %7653, %v5057_v45   ;;  %v5056_v44 = vadd.f32 %v5054_v63, %v5052_v25 }
 0x3e9   :  { %5168 = vperm.xlu1 %7652, %v5056_v44  }
 0x3ea   :  { %v5063_v51 = vpop.permute.xlu1 %5062 }
 0x3eb   :  { %5186 = vperm.xlu0 %7653, %v5037_v3   ;;  %vm5065_vm1 = vcmp.eq.s32.totalorder %v5063_v51, 1 }
 0x3ec   :  { %v5067_v33 = vsel %vm5065_vm1, %v7719_v18, %v8650_v37 }
 0x3ed   :  { %5181 = vperm.xlu1 %7652, %v5036_v49   ;;  %v5077_v40 = vsel %vm5075_vm13, %v7720_v34, %v5067_v33 }
 0x3ee   :  { %v5087_v56 = vsel %vm5085_vm15, %v7721_v62, %v5077_v40 }
 0x3ef   :  { %v5097_v43 = vsel %vm5095_vm0, %v7722_v53, %v5087_v56 }
 0x3f0   :  { %v5060_v29 = vpop.permute.xlu0 %5059  ;;  %5099 = vst [vmem:[#allocation5 + $0x8] sm:$0xff] %v5097_v43 }
 0x3f1   :  { %vm5064_vm2 = vcmp.eq.s32.totalorder %v5060_v29, 1 }
 0x3f2   :  { %v5066_v37 = vsel %vm5064_vm2, %v7723_v42, %v8589_v61 }
 0x3f3   :  { %v5076_v57 = vsel %vm5074_vm3, %v7724_v28, %v5066_v37 }
 0x3f4   :  { %v5086_v9 = vsel %vm5084_vm4, %v7725_v15, %v5076_v57 }
 0x3f5   :  { %v5096_v48 = vsel %vm5094_vm6, %v7726_v58, %v5086_v9 }
 0x3f6   :  { %5098 = vst [vmem:[#allocation5] sm:$0xff] %v5096_v48 }
 0x3f7   :  { %7760 = shalt.err (!%p7757_p12)
}
 0x3f8   :  { %s7761_s10 = scalar_lea.hbm %s8998_s2, 256 }
 0x3f9   :  { %p7762_p13 = scmp.ne.s32.totalorder %s8998_s2, %s7761_s10  ;;  %p7765_p0 = scmp.lt.u32.totalorder %s7761_s10, %s8998_s2 }
 0x3fb   :  { %p7767_p1 = pnand %p7765_p0, %p7762_p13 }
 0x3fd   :  { %7770 = shalt.err (!%p7767_p1)
}
 0x3fe   :  { %5205 = dma.vmem_to_hbm [thread:$0]  %s5200_s6, 256, %s8998_s2, [#allocation4], %s7776_s22, %s7776_s22, %s7777_s23   ;;  %vm5152_vm5 = vcmp.eq.s32.totalorder %v7883_v16, 4  ;;  %vm5165_vm14 = vcmp.eq.s32.totalorder %v7883_v16, 5  ;;  %vm5178_vm7 = vcmp.eq.s32.totalorder %v7883_v16, 6  ;;  %vm5191_vm8 = vcmask 56320  }
 0x45b   :  { %v5161_v61 = vpop.permute.xlu0 %5160 }
 0x45c   :  { %v5164_v59 = vsel %vm5152_vm5, %v5161_v61, %v5151_v32 }
 0x45d   :  { %v5156_v54 = vpop.permute.xlu1 %5155 }
 0x45e   :  { %v5163_v11 = vsel %vm5152_vm5, %v5156_v54, %v5150_v4 }
 0x466   :  { %v5174_v20 = vpop.permute.xlu0 %5173 }
 0x467   :  { %v5177_v60 = vsel %vm5165_vm14, %v5174_v20, %v5164_v59 }
 0x468   :  { %v5169_v22 = vpop.permute.xlu1 %5168 }
 0x469   :  { %v5176_v3 = vsel %vm5165_vm14, %v5169_v22, %v5163_v11 }
 0x46a   :  { %v5187_v5 = vpop.permute.xlu0 %5186 }
 0x46b   :  { %v5190_v6 = vsel %vm5178_vm7, %v5187_v5, %v5177_v60 }
 0x46c   :  { %5193 = vst.msk [vmem:[%s8999_s3 + $0x8] sm:$0xff] %vm5191_vm8, %v5190_v6  ;;  %v5182_v13 = vpop.permute.xlu1 %5181 }
 0x46d   :  { %v5189_v19 = vsel %vm5178_vm7, %v5182_v13, %v5176_v3 }
 0x46e   :  { %5192 = vst.msk [vmem:[%s8999_s3] sm:$0xff] %vm5191_vm8, %v5189_v19 }
 0x46f   :  { %7773 = dma.done.wait [#allocation4], 256  }
 0x470   :  { %7774 = vsyncadd [#allocation4], 4294967040 }
 0x471   :  { %5213 = vsyncpa [#allocation3], 1 }
 0x472   :  { %5214 = vsyncpa [#allocation4], 1 }

</bundles_post_ra>
